<compile_context>
chip_gen: v6e
topology: v6e:2x2x1
jax: 0.10.0
libtpu: 0.0.40
codegen_flags: <defaults>
</compile_context>

<pallas_src>
import math
import jax
import jax.numpy as jnp
from jax.experimental import pallas as pl
from jax.experimental.pallas import tpu as pltpu

# ------------------------- config -------------------------
B, S = 2, 8          # batch, sequence
E = 16               # embedding_size
H = 32               # hidden_size
NH = 4               # num_attention_heads
HD = H // NH         # attention_head_size
I = 64               # intermediate_size
L = 2                # num_hidden_layers (ALBERT shares the single group's weights)
EPS = 1e-12          # layer_norm_eps
BS = B * S           # rows fed to every matmul


# --------------------- in-kernel helpers -------------------
def _erf(x):
    # erf via Abramowitz & Stegun 7.1.26 (|abs err| < 1.5e-7); only exp/mul/add,
    # which map to EUP + VPU (lax.erf has no guaranteed Mosaic lowering).
    a1, a2, a3, a4, a5 = 0.254829592, -0.284496736, 1.421413741, -1.453152027, 1.061405429
    p = 0.3275911
    s = jnp.where(x >= 0.0, 1.0, -1.0)
    ax = jnp.abs(x)
    t = 1.0 / (1.0 + p * ax)
    poly = ((((a5 * t + a4) * t + a3) * t + a2) * t + a1) * t
    return s * (1.0 - poly * jnp.exp(-ax * ax))


def _gelu(x):
    # matches torch gelu(x) = x * 0.5 * (1 + erf(x / sqrt(2)))
    return x * 0.5 * (1.0 + _erf(x / math.sqrt(2.0)))


def _layer_norm(x, g, b):
    # g, b stay (1, H); the mul/add broadcast them for free (no broadcast_to).
    mu = jnp.mean(x, axis=-1, keepdims=True)
    var = jnp.mean((x - mu) ** 2, axis=-1, keepdims=True)      # biased, like torch
    return (x - mu) * jax.lax.rsqrt(var + EPS) * g + b


# ------------------------- fused kernel -------------------------
def albert_fused_kernel(x_ref, mask_ref, embw_ref, embb_ref, wqkv_ref, bqkv_ref,
                        wo_ref, bo_ref, g1_ref, be1_ref, w1_ref, b1_ref,
                        w2_ref, b2_ref, g2_ref, be2_ref, o_ref):
    """Embedding projection + L unrolled shared-weight ALBERT layers.

    x_ref    : (B*S, E)   input embeddings, batch folded into rows (matmul M dim)
    mask_ref : (B, S)     additive key-padding mask (0 / -10000), per batch
    weights  : separate, unsliced VMEM operands (Q columns of Wqkv pre-scaled)
    o_ref    : (B*S, H)   output hidden states
    """
    x = x_ref[...]                       # (BS, E)
    mask = mask_ref[...]                 # (B, S)

    embw = embw_ref[...]                 # (E, H)
    wqkv = wqkv_ref[...]                 # (H, 3H)  [Wq*1/sqrt(HD) | Wk | Wv]
    wo = wo_ref[...]                     # (H, H)
    w1 = w1_ref[...]                     # (H, I)
    w2 = w2_ref[...]                     # (I, H)
    # bias / gamma / beta stay (1, w); no jnp.broadcast_to (implicit broadcast).
    embb = embb_ref[...]
    bqkv = bqkv_ref[...]
    bo = bo_ref[...]
    g1, be1 = g1_ref[...], be1_ref[...]
    b1, b2 = b1_ref[...], b2_ref[...]
    g2, be2 = g2_ref[...], be2_ref[...]

    # ---- embedding_hidden_mapping_in ----
    h = jnp.dot(x, embw, preferred_element_type=jnp.float32) + embb     # (BS, H)

    dn_qkT = (((1,), (1,)), ((), ()))    # contract last dims: q @ k^T without .T

    # ---- L shared-weight ALBERT layers, unrolled in-kernel ----
    for _ in range(L):
        # fused QKV projection: one MXU pass; 1/sqrt(HD) already folded into Q
        qkv = jnp.dot(h, wqkv, preferred_element_type=jnp.float32) + bqkv    # (BS, 3H)
        q_all = qkv[:, 0:H]
        k_all = qkv[:, H:2 * H]
        v_all = qkv[:, 2 * H:3 * H]

        # per-head, per-batch attention (no (BS,BS) block-diagonal mask / no
        # cross-batch FLOPs); heads sliced once from q_all/k_all/v_all, batch
        # blocks are cheap sublane (row) slices.
        ctx_parts = [[None] * NH for _ in range(B)]
        for hh in range(NH):
            c0, c1 = hh * HD, (hh + 1) * HD
            q_h = q_all[:, c0:c1]                          # (BS, HD)
            k_h = k_all[:, c0:c1]
            v_h = v_all[:, c0:c1]
            for b in range(B):
                r0, r1 = b * S, (b + 1) * S
                s = jax.lax.dot_general(q_h[r0:r1, :], k_h[r0:r1, :],
                                        dimension_numbers=dn_qkT,
                                        preferred_element_type=jnp.float32)   # (S, S)
                s = s + mask[b:b + 1, :]                   # (1, S) key mask broadcast
                s = s - jnp.max(s, axis=-1, keepdims=True)
                p = jnp.exp(s)
                # normalize AFTER the P.V matmul on the (S,1) sums (EUP recip)
                inv = pl.reciprocal(jnp.sum(p, axis=-1, keepdims=True), approx=False)
                ctx_parts[b][hh] = jnp.dot(p, v_h[r0:r1, :],
                                           preferred_element_type=jnp.float32) * inv

        # one lane-concat per batch + row-concat -> single K=H output projection
        ctx_all = jnp.concatenate(
            [jnp.concatenate(ctx_parts[b], axis=-1) for b in range(B)], axis=0)  # (BS, H)

        attn = jnp.dot(ctx_all, wo, preferred_element_type=jnp.float32) + bo
        attn = _layer_norm(attn + h, g1, be1)

        inter = _gelu(jnp.dot(attn, w1, preferred_element_type=jnp.float32) + b1)
        ffn = jnp.dot(inter, w2, preferred_element_type=jnp.float32) + b2
        h = _layer_norm(ffn + attn, g2, be2)

    o_ref[...] = h


# ------------------------- wrappers -------------------------
def prepare_params(params):
    """One-time parameter prep (hoisted out of the per-forward path).

    Fuses Q/K/V into one (H, 3H) weight, folds the 1/sqrt(HD) attention scale
    into the Q columns + bq, and returns a flat tuple of separate (unsliced)
    kernel operands.
    """
    lp = params["layer"]
    scale = 1.0 / math.sqrt(HD)
    wqkv = jnp.concatenate([lp["wq"] * scale, lp["wk"], lp["wv"]], axis=1)   # (H, 3H)
    bqkv = jnp.concatenate([lp["bq"] * scale, lp["bk"], lp["bv"]], axis=1)   # (1, 3H)
    return (params["emb_w"], params["emb_b"], wqkv, bqkv,
            lp["wo"], lp["bo"], lp["ln1_g"], lp["ln1_b"],
            lp["w1"], lp["b1"], lp["w2"], lp["b2"], lp["ln2_g"], lp["ln2_b"])


def albert_encoder(hidden_states, attention_mask, kparams):
    # Flatten batch into the matmul M dimension; mask stays a small (B, S)
    # additive key mask (no dense (BS, BS) mask is ever built).
    x2 = hidden_states.reshape(BS, E)
    mask2 = attention_mask.reshape(B, S)

    n_in = 2 + len(kparams)
    vmem = pltpu.MemorySpace.VMEM
    out = pl.pallas_call(
        albert_fused_kernel,
        out_shape=jax.ShapeDtypeStruct((BS, H), jnp.float32),
        in_specs=[pl.BlockSpec(memory_space=vmem) for _ in range(n_in)],
        out_specs=pl.BlockSpec(memory_space=vmem),
    )(x2, mask2, *kparams)
    return out.reshape(B, S, H)


# ------------------------- parameters -------------------------
def init_params(key):
    ks = jax.random.split(key, 16)
    w = lambda k, shp: (0.02 * jax.random.normal(k, shp)).astype(jnp.float32)
    layer = dict(
        wq=w(ks[1], (H, H)), bq=w(ks[2], (1, H)),
        wk=w(ks[3], (H, H)), bk=w(ks[4], (1, H)),
        wv=w(ks[5], (H, H)), bv=w(ks[6], (1, H)),
        wo=w(ks[7], (H, H)), bo=w(ks[8], (1, H)),
        ln1_g=(1.0 + w(ks[9], (1, H))), ln1_b=w(ks[10], (1, H)),
        w1=w(ks[11], (H, I)), b1=w(ks[12], (1, I)),
        w2=w(ks[13], (I, H)), b2=w(ks[14], (1, H)),
        ln2_g=(1.0 + w(ks[15], (1, H))), ln2_b=jnp.zeros((1, H), jnp.float32),
    )
    return dict(emb_w=w(ks[0], (E, H)), emb_b=jnp.zeros((1, H), jnp.float32), layer=layer)


# --------------------- pure-JAX reference ---------------------
def ref_encoder(x, mask, params):
    from jax.scipy.special import erf

    def ln(t, g, b):
        mu = t.mean(-1, keepdims=True)
        var = ((t - mu) ** 2).mean(-1, keepdims=True)
        return (t - mu) / jnp.sqrt(var + EPS) * g + b

    h = x @ params["emb_w"] + params["emb_b"]
    p = params["layer"]
    for _ in range(L):
        q = h @ p["wq"] + p["bq"]
        k = h @ p["wk"] + p["bk"]
        v = h @ p["wv"] + p["bv"]
        split = lambda t: t.reshape(B, S, NH, HD).transpose(0, 2, 1, 3)
        qh, kh, vh = split(q), split(k), split(v)
        sc = jnp.einsum("bhqd,bhkd->bhqk", qh, kh) / math.sqrt(HD)
        sc = sc + mask[:, None, :, :]                 # (B,1,1,S) additive mask
        pr = jax.nn.softmax(sc, axis=-1)
        ctx = jnp.einsum("bhqk,bhkd->bhqd", pr, vh).transpose(0, 2, 1, 3).reshape(B, S, H)
        attn = ln(ctx @ p["wo"] + p["bo"] + h, p["ln1_g"], p["ln1_b"])
        inter = attn @ p["w1"] + p["b1"]
        inter = inter * 0.5 * (1.0 + erf(inter / math.sqrt(2.0)))
        ffn = inter @ p["w2"] + p["b2"]
        h = ln(ffn + attn, p["ln2_g"], p["ln2_b"])
    return h


# ----------------------------- main -----------------------------
if __name__ == "__main__":
    key = jax.random.PRNGKey(0)
    kx, kp = jax.random.split(key)
    hidden_states = jax.random.normal(kx, (B, S, E), jnp.float32)
    attention_mask = jnp.zeros((B, 1, S), jnp.float32)
    attention_mask = attention_mask.at[1, 0, 6:].set(-10000.0)  # mask last 2 keys of batch 1
    params = init_params(kp)

    # One-time packing / scale fold, outside the jitted per-call path.
    kparams = prepare_params(params)

    fwd = jax.jit(albert_encoder)
    out = jax.block_until_ready(fwd(hidden_states, attention_mask, kparams))

    ref = ref_encoder(hidden_states, attention_mask, params)
    err = float(jnp.max(jnp.abs(out - ref)))
    assert out.shape == (B, S, H)
    assert err < 1e-4, f"max abs error {err}"
    print("KERNEL_OK")
</pallas_src>

<mosaic_0001>
module attributes {stable_mosaic.version = 11 : i64} {
  func.func @albert_fused_kernel(%arg0: memref<16x16xf32, #tpu.memory_space<vmem>>, %arg1: memref<2x8xf32, #tpu.memory_space<vmem>>, %arg2: memref<16x32xf32, #tpu.memory_space<vmem>>, %arg3: memref<1x32xf32, #tpu.memory_space<vmem>>, %arg4: memref<32x96xf32, #tpu.memory_space<vmem>>, %arg5: memref<1x96xf32, #tpu.memory_space<vmem>>, %arg6: memref<32x32xf32, #tpu.memory_space<vmem>>, %arg7: memref<1x32xf32, #tpu.memory_space<vmem>>, %arg8: memref<1x32xf32, #tpu.memory_space<vmem>>, %arg9: memref<1x32xf32, #tpu.memory_space<vmem>>, %arg10: memref<32x64xf32, #tpu.memory_space<vmem>>, %arg11: memref<1x64xf32, #tpu.memory_space<vmem>>, %arg12: memref<64x32xf32, #tpu.memory_space<vmem>>, %arg13: memref<1x32xf32, #tpu.memory_space<vmem>>, %arg14: memref<1x32xf32, #tpu.memory_space<vmem>>, %arg15: memref<1x32xf32, #tpu.memory_space<vmem>>, %arg16: memref<16x32xf32, #tpu.memory_space<vmem>>) attributes {dimension_semantics = [], scalar_prefetch = 0 : i64, scratch_operands = 0 : i64, tpu.core_type = #tpu.core_type<tc>} {
    %c0 = arith.constant 0 : index
    %c0_0 = arith.constant 0 : index
    %0 = vector.load %arg0[%c0, %c0_0] : memref<16x16xf32, #tpu.memory_space<vmem>>, vector<16x16xf32>
    %c0_1 = arith.constant 0 : index
    %c0_2 = arith.constant 0 : index
    %1 = vector.load %arg1[%c0_1, %c0_2] : memref<2x8xf32, #tpu.memory_space<vmem>>, vector<2x8xf32>
    %c0_3 = arith.constant 0 : index
    %c0_4 = arith.constant 0 : index
    %2 = vector.load %arg2[%c0_3, %c0_4] : memref<16x32xf32, #tpu.memory_space<vmem>>, vector<16x32xf32>
    %c0_5 = arith.constant 0 : index
    %c0_6 = arith.constant 0 : index
    %3 = vector.load %arg4[%c0_5, %c0_6] : memref<32x96xf32, #tpu.memory_space<vmem>>, vector<32x96xf32>
    %c0_7 = arith.constant 0 : index
    %c0_8 = arith.constant 0 : index
    %4 = vector.load %arg6[%c0_7, %c0_8] : memref<32x32xf32, #tpu.memory_space<vmem>>, vector<32x32xf32>
    %c0_9 = arith.constant 0 : index
    %c0_10 = arith.constant 0 : index
    %5 = vector.load %arg10[%c0_9, %c0_10] : memref<32x64xf32, #tpu.memory_space<vmem>>, vector<32x64xf32>
    %c0_11 = arith.constant 0 : index
    %c0_12 = arith.constant 0 : index
    %6 = vector.load %arg12[%c0_11, %c0_12] : memref<64x32xf32, #tpu.memory_space<vmem>>, vector<64x32xf32>
    %c0_13 = arith.constant 0 : index
    %c0_14 = arith.constant 0 : index
    %7 = vector.load %arg3[%c0_13, %c0_14] : memref<1x32xf32, #tpu.memory_space<vmem>>, vector<1x32xf32>
    %c0_15 = arith.constant 0 : index
    %c0_16 = arith.constant 0 : index
    %8 = vector.load %arg5[%c0_15, %c0_16] : memref<1x96xf32, #tpu.memory_space<vmem>>, vector<1x96xf32>
    %c0_17 = arith.constant 0 : index
    %c0_18 = arith.constant 0 : index
    %9 = vector.load %arg7[%c0_17, %c0_18] : memref<1x32xf32, #tpu.memory_space<vmem>>, vector<1x32xf32>
    %c0_19 = arith.constant 0 : index
    %c0_20 = arith.constant 0 : index
    %10 = vector.load %arg8[%c0_19, %c0_20] : memref<1x32xf32, #tpu.memory_space<vmem>>, vector<1x32xf32>
    %c0_21 = arith.constant 0 : index
    %c0_22 = arith.constant 0 : index
    %11 = vector.load %arg9[%c0_21, %c0_22] : memref<1x32xf32, #tpu.memory_space<vmem>>, vector<1x32xf32>
    %c0_23 = arith.constant 0 : index
    %c0_24 = arith.constant 0 : index
    %12 = vector.load %arg11[%c0_23, %c0_24] : memref<1x64xf32, #tpu.memory_space<vmem>>, vector<1x64xf32>
    %c0_25 = arith.constant 0 : index
    %c0_26 = arith.constant 0 : index
    %13 = vector.load %arg13[%c0_25, %c0_26] : memref<1x32xf32, #tpu.memory_space<vmem>>, vector<1x32xf32>
    %c0_27 = arith.constant 0 : index
    %c0_28 = arith.constant 0 : index
    %14 = vector.load %arg14[%c0_27, %c0_28] : memref<1x32xf32, #tpu.memory_space<vmem>>, vector<1x32xf32>
    %c0_29 = arith.constant 0 : index
    %c0_30 = arith.constant 0 : index
    %15 = vector.load %arg15[%c0_29, %c0_30] : memref<1x32xf32, #tpu.memory_space<vmem>>, vector<1x32xf32>
    %cst = arith.constant dense<0.000000e+00> : vector<16x32xf32>
    %16 = tpu.matmul %0, %2, %cst {dimension_numbers = #tpu.dot_dimension_numbers<[1], [0], [0], [1], [0, 0, 1, 1], [], []>} : vector<16x16xf32>, vector<16x32xf32>, vector<16x32xf32> -> vector<16x32xf32>
    %17 = vector.broadcast %7 : vector<1x32xf32> to vector<16x32xf32>
    %18 = arith.addf %16, %17 : vector<16x32xf32>
    %cst_31 = arith.constant dense<0.000000e+00> : vector<16x96xf32>
    %19 = tpu.matmul %18, %3, %cst_31 {dimension_numbers = #tpu.dot_dimension_numbers<[1], [0], [0], [1], [0, 0, 1, 1], [], []>} : vector<16x32xf32>, vector<32x96xf32>, vector<16x96xf32> -> vector<16x96xf32>
    %20 = vector.broadcast %8 : vector<1x96xf32> to vector<16x96xf32>
    %21 = arith.addf %19, %20 : vector<16x96xf32>
    %22 = vector.extract_strided_slice %21 {offsets = [0, 0], sizes = [16, 32], strides = [1, 1]} : vector<16x96xf32> to vector<16x32xf32>
    %23 = vector.extract_strided_slice %21 {offsets = [0, 32], sizes = [16, 32], strides = [1, 1]} : vector<16x96xf32> to vector<16x32xf32>
    %24 = vector.extract_strided_slice %21 {offsets = [0, 64], sizes = [16, 32], strides = [1, 1]} : vector<16x96xf32> to vector<16x32xf32>
    %25 = vector.extract_strided_slice %22 {offsets = [0, 0], sizes = [16, 8], strides = [1, 1]} : vector<16x32xf32> to vector<16x8xf32>
    %26 = vector.extract_strided_slice %23 {offsets = [0, 0], sizes = [16, 8], strides = [1, 1]} : vector<16x32xf32> to vector<16x8xf32>
    %27 = vector.extract_strided_slice %24 {offsets = [0, 0], sizes = [16, 8], strides = [1, 1]} : vector<16x32xf32> to vector<16x8xf32>
    %28 = vector.extract_strided_slice %25 {offsets = [0, 0], sizes = [8, 8], strides = [1, 1]} : vector<16x8xf32> to vector<8x8xf32>
    %29 = vector.extract_strided_slice %26 {offsets = [0, 0], sizes = [8, 8], strides = [1, 1]} : vector<16x8xf32> to vector<8x8xf32>
    %cst_32 = arith.constant dense<0.000000e+00> : vector<8x8xf32>
    %30 = tpu.matmul %28, %29, %cst_32 {dimension_numbers = #tpu.dot_dimension_numbers<[1], [1], [0], [0], [0, 0, 1, 0], [], []>} : vector<8x8xf32>, vector<8x8xf32>, vector<8x8xf32> -> vector<8x8xf32>
    %31 = vector.extract_strided_slice %1 {offsets = [0, 0], sizes = [1, 8], strides = [1, 1]} : vector<2x8xf32> to vector<1x8xf32>
    %32 = vector.broadcast %31 : vector<1x8xf32> to vector<8x8xf32>
    %33 = arith.addf %30, %32 : vector<8x8xf32>
    %cst_33 = arith.constant dense<0xFF800000> : vector<8xf32>
    %34 = vector.multi_reduction <maximumf>, %33, %cst_33 [1] : vector<8x8xf32> to vector<8xf32>
    %35 = vector.shape_cast %34 : vector<8xf32> to vector<8x1xf32>
    %36 = vector.broadcast %35 : vector<8x1xf32> to vector<8x8xf32>
    %37 = arith.subf %33, %36 : vector<8x8xf32>
    %38 = math.exp %37 : vector<8x8xf32>
    %cst_34 = arith.constant dense<0.000000e+00> : vector<8xf32>
    %39 = vector.multi_reduction <add>, %38, %cst_34 [1] : vector<8x8xf32> to vector<8xf32>
    %40 = vector.shape_cast %39 : vector<8xf32> to vector<8x1xf32>
    %41 = tpu.reciprocal %40 : vector<8x1xf32> -> vector<8x1xf32>
    %42 = vector.extract_strided_slice %27 {offsets = [0, 0], sizes = [8, 8], strides = [1, 1]} : vector<16x8xf32> to vector<8x8xf32>
    %cst_35 = arith.constant dense<0.000000e+00> : vector<8x8xf32>
    %43 = tpu.matmul %38, %42, %cst_35 {dimension_numbers = #tpu.dot_dimension_numbers<[1], [0], [0], [1], [0, 0, 1, 1], [], []>} : vector<8x8xf32>, vector<8x8xf32>, vector<8x8xf32> -> vector<8x8xf32>
    %44 = vector.broadcast %41 : vector<8x1xf32> to vector<8x8xf32>
    %45 = arith.mulf %43, %44 : vector<8x8xf32>
    %46 = vector.extract_strided_slice %25 {offsets = [8, 0], sizes = [8, 8], strides = [1, 1]} : vector<16x8xf32> to vector<8x8xf32>
    %47 = vector.extract_strided_slice %26 {offsets = [8, 0], sizes = [8, 8], strides = [1, 1]} : vector<16x8xf32> to vector<8x8xf32>
    %cst_36 = arith.constant dense<0.000000e+00> : vector<8x8xf32>
    %48 = tpu.matmul %46, %47, %cst_36 {dimension_numbers = #tpu.dot_dimension_numbers<[1], [1], [0], [0], [0, 0, 1, 0], [], []>} : vector<8x8xf32>, vector<8x8xf32>, vector<8x8xf32> -> vector<8x8xf32>
    %49 = vector.extract_strided_slice %1 {offsets = [1, 0], sizes = [1, 8], strides = [1, 1]} : vector<2x8xf32> to vector<1x8xf32>
    %50 = vector.broadcast %49 : vector<1x8xf32> to vector<8x8xf32>
    %51 = arith.addf %48, %50 : vector<8x8xf32>
    %cst_37 = arith.constant dense<0xFF800000> : vector<8xf32>
    %52 = vector.multi_reduction <maximumf>, %51, %cst_37 [1] : vector<8x8xf32> to vector<8xf32>
    %53 = vector.shape_cast %52 : vector<8xf32> to vector<8x1xf32>
    %54 = vector.broadcast %53 : vector<8x1xf32> to vector<8x8xf32>
    %55 = arith.subf %51, %54 : vector<8x8xf32>
    %56 = math.exp %55 : vector<8x8xf32>
    %cst_38 = arith.constant dense<0.000000e+00> : vector<8xf32>
    %57 = vector.multi_reduction <add>, %56, %cst_38 [1] : vector<8x8xf32> to vector<8xf32>
    %58 = vector.shape_cast %57 : vector<8xf32> to vector<8x1xf32>
    %59 = tpu.reciprocal %58 : vector<8x1xf32> -> vector<8x1xf32>
    %60 = vector.extract_strided_slice %27 {offsets = [8, 0], sizes = [8, 8], strides = [1, 1]} : vector<16x8xf32> to vector<8x8xf32>
    %cst_39 = arith.constant dense<0.000000e+00> : vector<8x8xf32>
    %61 = tpu.matmul %56, %60, %cst_39 {dimension_numbers = #tpu.dot_dimension_numbers<[1], [0], [0], [1], [0, 0, 1, 1], [], []>} : vector<8x8xf32>, vector<8x8xf32>, vector<8x8xf32> -> vector<8x8xf32>
    %62 = vector.broadcast %59 : vector<8x1xf32> to vector<8x8xf32>
    %63 = arith.mulf %61, %62 : vector<8x8xf32>
    %64 = vector.extract_strided_slice %22 {offsets = [0, 8], sizes = [16, 8], strides = [1, 1]} : vector<16x32xf32> to vector<16x8xf32>
    %65 = vector.extract_strided_slice %23 {offsets = [0, 8], sizes = [16, 8], strides = [1, 1]} : vector<16x32xf32> to vector<16x8xf32>
    %66 = vector.extract_strided_slice %24 {offsets = [0, 8], sizes = [16, 8], strides = [1, 1]} : vector<16x32xf32> to vector<16x8xf32>
    %67 = vector.extract_strided_slice %64 {offsets = [0, 0], sizes = [8, 8], strides = [1, 1]} : vector<16x8xf32> to vector<8x8xf32>
    %68 = vector.extract_strided_slice %65 {offsets = [0, 0], sizes = [8, 8], strides = [1, 1]} : vector<16x8xf32> to vector<8x8xf32>
    %cst_40 = arith.constant dense<0.000000e+00> : vector<8x8xf32>
    %69 = tpu.matmul %67, %68, %cst_40 {dimension_numbers = #tpu.dot_dimension_numbers<[1], [1], [0], [0], [0, 0, 1, 0], [], []>} : vector<8x8xf32>, vector<8x8xf32>, vector<8x8xf32> -> vector<8x8xf32>
    %70 = vector.extract_strided_slice %1 {offsets = [0, 0], sizes = [1, 8], strides = [1, 1]} : vector<2x8xf32> to vector<1x8xf32>
    %71 = vector.broadcast %70 : vector<1x8xf32> to vector<8x8xf32>
    %72 = arith.addf %69, %71 : vector<8x8xf32>
    %cst_41 = arith.constant dense<0xFF800000> : vector<8xf32>
    %73 = vector.multi_reduction <maximumf>, %72, %cst_41 [1] : vector<8x8xf32> to vector<8xf32>
    %74 = vector.shape_cast %73 : vector<8xf32> to vector<8x1xf32>
    %75 = vector.broadcast %74 : vector<8x1xf32> to vector<8x8xf32>
    %76 = arith.subf %72, %75 : vector<8x8xf32>
    %77 = math.exp %76 : vector<8x8xf32>
    %cst_42 = arith.constant dense<0.000000e+00> : vector<8xf32>
    %78 = vector.multi_reduction <add>, %77, %cst_42 [1] : vector<8x8xf32> to vector<8xf32>
    %79 = vector.shape_cast %78 : vector<8xf32> to vector<8x1xf32>
    %80 = tpu.reciprocal %79 : vector<8x1xf32> -> vector<8x1xf32>
    %81 = vector.extract_strided_slice %66 {offsets = [0, 0], sizes = [8, 8], strides = [1, 1]} : vector<16x8xf32> to vector<8x8xf32>
    %cst_43 = arith.constant dense<0.000000e+00> : vector<8x8xf32>
    %82 = tpu.matmul %77, %81, %cst_43 {dimension_numbers = #tpu.dot_dimension_numbers<[1], [0], [0], [1], [0, 0, 1, 1], [], []>} : vector<8x8xf32>, vector<8x8xf32>, vector<8x8xf32> -> vector<8x8xf32>
    %83 = vector.broadcast %80 : vector<8x1xf32> to vector<8x8xf32>
    %84 = arith.mulf %82, %83 : vector<8x8xf32>
    %85 = vector.extract_strided_slice %64 {offsets = [8, 0], sizes = [8, 8], strides = [1, 1]} : vector<16x8xf32> to vector<8x8xf32>
    %86 = vector.extract_strided_slice %65 {offsets = [8, 0], sizes = [8, 8], strides = [1, 1]} : vector<16x8xf32> to vector<8x8xf32>
    %cst_44 = arith.constant dense<0.000000e+00> : vector<8x8xf32>
    %87 = tpu.matmul %85, %86, %cst_44 {dimension_numbers = #tpu.dot_dimension_numbers<[1], [1], [0], [0], [0, 0, 1, 0], [], []>} : vector<8x8xf32>, vector<8x8xf32>, vector<8x8xf32> -> vector<8x8xf32>
    %88 = vector.extract_strided_slice %1 {offsets = [1, 0], sizes = [1, 8], strides = [1, 1]} : vector<2x8xf32> to vector<1x8xf32>
    %89 = vector.broadcast %88 : vector<1x8xf32> to vector<8x8xf32>
    %90 = arith.addf %87, %89 : vector<8x8xf32>
    %cst_45 = arith.constant dense<0xFF800000> : vector<8xf32>
    %91 = vector.multi_reduction <maximumf>, %90, %cst_45 [1] : vector<8x8xf32> to vector<8xf32>
    %92 = vector.shape_cast %91 : vector<8xf32> to vector<8x1xf32>
    %93 = vector.broadcast %92 : vector<8x1xf32> to vector<8x8xf32>
    %94 = arith.subf %90, %93 : vector<8x8xf32>
    %95 = math.exp %94 : vector<8x8xf32>
    %cst_46 = arith.constant dense<0.000000e+00> : vector<8xf32>
    %96 = vector.multi_reduction <add>, %95, %cst_46 [1] : vector<8x8xf32> to vector<8xf32>
    %97 = vector.shape_cast %96 : vector<8xf32> to vector<8x1xf32>
    %98 = tpu.reciprocal %97 : vector<8x1xf32> -> vector<8x1xf32>
    %99 = vector.extract_strided_slice %66 {offsets = [8, 0], sizes = [8, 8], strides = [1, 1]} : vector<16x8xf32> to vector<8x8xf32>
    %cst_47 = arith.constant dense<0.000000e+00> : vector<8x8xf32>
    %100 = tpu.matmul %95, %99, %cst_47 {dimension_numbers = #tpu.dot_dimension_numbers<[1], [0], [0], [1], [0, 0, 1, 1], [], []>} : vector<8x8xf32>, vector<8x8xf32>, vector<8x8xf32> -> vector<8x8xf32>
    %101 = vector.broadcast %98 : vector<8x1xf32> to vector<8x8xf32>
    %102 = arith.mulf %100, %101 : vector<8x8xf32>
    %103 = vector.extract_strided_slice %22 {offsets = [0, 16], sizes = [16, 8], strides = [1, 1]} : vector<16x32xf32> to vector<16x8xf32>
    %104 = vector.extract_strided_slice %23 {offsets = [0, 16], sizes = [16, 8], strides = [1, 1]} : vector<16x32xf32> to vector<16x8xf32>
    %105 = vector.extract_strided_slice %24 {offsets = [0, 16], sizes = [16, 8], strides = [1, 1]} : vector<16x32xf32> to vector<16x8xf32>
    %106 = vector.extract_strided_slice %103 {offsets = [0, 0], sizes = [8, 8], strides = [1, 1]} : vector<16x8xf32> to vector<8x8xf32>
    %107 = vector.extract_strided_slice %104 {offsets = [0, 0], sizes = [8, 8], strides = [1, 1]} : vector<16x8xf32> to vector<8x8xf32>
    %cst_48 = arith.constant dense<0.000000e+00> : vector<8x8xf32>
    %108 = tpu.matmul %106, %107, %cst_48 {dimension_numbers = #tpu.dot_dimension_numbers<[1], [1], [0], [0], [0, 0, 1, 0], [], []>} : vector<8x8xf32>, vector<8x8xf32>, vector<8x8xf32> -> vector<8x8xf32>
    %109 = vector.extract_strided_slice %1 {offsets = [0, 0], sizes = [1, 8], strides = [1, 1]} : vector<2x8xf32> to vector<1x8xf32>
    %110 = vector.broadcast %109 : vector<1x8xf32> to vector<8x8xf32>
    %111 = arith.addf %108, %110 : vector<8x8xf32>
    %cst_49 = arith.constant dense<0xFF800000> : vector<8xf32>
    %112 = vector.multi_reduction <maximumf>, %111, %cst_49 [1] : vector<8x8xf32> to vector<8xf32>
    %113 = vector.shape_cast %112 : vector<8xf32> to vector<8x1xf32>
    %114 = vector.broadcast %113 : vector<8x1xf32> to vector<8x8xf32>
    %115 = arith.subf %111, %114 : vector<8x8xf32>
    %116 = math.exp %115 : vector<8x8xf32>
    %cst_50 = arith.constant dense<0.000000e+00> : vector<8xf32>
    %117 = vector.multi_reduction <add>, %116, %cst_50 [1] : vector<8x8xf32> to vector<8xf32>
    %118 = vector.shape_cast %117 : vector<8xf32> to vector<8x1xf32>
    %119 = tpu.reciprocal %118 : vector<8x1xf32> -> vector<8x1xf32>
    %120 = vector.extract_strided_slice %105 {offsets = [0, 0], sizes = [8, 8], strides = [1, 1]} : vector<16x8xf32> to vector<8x8xf32>
    %cst_51 = arith.constant dense<0.000000e+00> : vector<8x8xf32>
    %121 = tpu.matmul %116, %120, %cst_51 {dimension_numbers = #tpu.dot_dimension_numbers<[1], [0], [0], [1], [0, 0, 1, 1], [], []>} : vector<8x8xf32>, vector<8x8xf32>, vector<8x8xf32> -> vector<8x8xf32>
    %122 = vector.broadcast %119 : vector<8x1xf32> to vector<8x8xf32>
    %123 = arith.mulf %121, %122 : vector<8x8xf32>
    %124 = vector.extract_strided_slice %103 {offsets = [8, 0], sizes = [8, 8], strides = [1, 1]} : vector<16x8xf32> to vector<8x8xf32>
    %125 = vector.extract_strided_slice %104 {offsets = [8, 0], sizes = [8, 8], strides = [1, 1]} : vector<16x8xf32> to vector<8x8xf32>
    %cst_52 = arith.constant dense<0.000000e+00> : vector<8x8xf32>
    %126 = tpu.matmul %124, %125, %cst_52 {dimension_numbers = #tpu.dot_dimension_numbers<[1], [1], [0], [0], [0, 0, 1, 0], [], []>} : vector<8x8xf32>, vector<8x8xf32>, vector<8x8xf32> -> vector<8x8xf32>
    %127 = vector.extract_strided_slice %1 {offsets = [1, 0], sizes = [1, 8], strides = [1, 1]} : vector<2x8xf32> to vector<1x8xf32>
    %128 = vector.broadcast %127 : vector<1x8xf32> to vector<8x8xf32>
    %129 = arith.addf %126, %128 : vector<8x8xf32>
    %cst_53 = arith.constant dense<0xFF800000> : vector<8xf32>
    %130 = vector.multi_reduction <maximumf>, %129, %cst_53 [1] : vector<8x8xf32> to vector<8xf32>
    %131 = vector.shape_cast %130 : vector<8xf32> to vector<8x1xf32>
    %132 = vector.broadcast %131 : vector<8x1xf32> to vector<8x8xf32>
    %133 = arith.subf %129, %132 : vector<8x8xf32>
    %134 = math.exp %133 : vector<8x8xf32>
    %cst_54 = arith.constant dense<0.000000e+00> : vector<8xf32>
    %135 = vector.multi_reduction <add>, %134, %cst_54 [1] : vector<8x8xf32> to vector<8xf32>
    %136 = vector.shape_cast %135 : vector<8xf32> to vector<8x1xf32>
    %137 = tpu.reciprocal %136 : vector<8x1xf32> -> vector<8x1xf32>
    %138 = vector.extract_strided_slice %105 {offsets = [8, 0], sizes = [8, 8], strides = [1, 1]} : vector<16x8xf32> to vector<8x8xf32>
    %cst_55 = arith.constant dense<0.000000e+00> : vector<8x8xf32>
    %139 = tpu.matmul %134, %138, %cst_55 {dimension_numbers = #tpu.dot_dimension_numbers<[1], [0], [0], [1], [0, 0, 1, 1], [], []>} : vector<8x8xf32>, vector<8x8xf32>, vector<8x8xf32> -> vector<8x8xf32>
    %140 = vector.broadcast %137 : vector<8x1xf32> to vector<8x8xf32>
    %141 = arith.mulf %139, %140 : vector<8x8xf32>
    %142 = vector.extract_strided_slice %22 {offsets = [0, 24], sizes = [16, 8], strides = [1, 1]} : vector<16x32xf32> to vector<16x8xf32>
    %143 = vector.extract_strided_slice %23 {offsets = [0, 24], sizes = [16, 8], strides = [1, 1]} : vector<16x32xf32> to vector<16x8xf32>
    %144 = vector.extract_strided_slice %24 {offsets = [0, 24], sizes = [16, 8], strides = [1, 1]} : vector<16x32xf32> to vector<16x8xf32>
    %145 = vector.extract_strided_slice %142 {offsets = [0, 0], sizes = [8, 8], strides = [1, 1]} : vector<16x8xf32> to vector<8x8xf32>
    %146 = vector.extract_strided_slice %143 {offsets = [0, 0], sizes = [8, 8], strides = [1, 1]} : vector<16x8xf32> to vector<8x8xf32>
    %cst_56 = arith.constant dense<0.000000e+00> : vector<8x8xf32>
    %147 = tpu.matmul %145, %146, %cst_56 {dimension_numbers = #tpu.dot_dimension_numbers<[1], [1], [0], [0], [0, 0, 1, 0], [], []>} : vector<8x8xf32>, vector<8x8xf32>, vector<8x8xf32> -> vector<8x8xf32>
    %148 = vector.extract_strided_slice %1 {offsets = [0, 0], sizes = [1, 8], strides = [1, 1]} : vector<2x8xf32> to vector<1x8xf32>
    %149 = vector.broadcast %148 : vector<1x8xf32> to vector<8x8xf32>
    %150 = arith.addf %147, %149 : vector<8x8xf32>
    %cst_57 = arith.constant dense<0xFF800000> : vector<8xf32>
    %151 = vector.multi_reduction <maximumf>, %150, %cst_57 [1] : vector<8x8xf32> to vector<8xf32>
    %152 = vector.shape_cast %151 : vector<8xf32> to vector<8x1xf32>
    %153 = vector.broadcast %152 : vector<8x1xf32> to vector<8x8xf32>
    %154 = arith.subf %150, %153 : vector<8x8xf32>
    %155 = math.exp %154 : vector<8x8xf32>
    %cst_58 = arith.constant dense<0.000000e+00> : vector<8xf32>
    %156 = vector.multi_reduction <add>, %155, %cst_58 [1] : vector<8x8xf32> to vector<8xf32>
    %157 = vector.shape_cast %156 : vector<8xf32> to vector<8x1xf32>
    %158 = tpu.reciprocal %157 : vector<8x1xf32> -> vector<8x1xf32>
    %159 = vector.extract_strided_slice %144 {offsets = [0, 0], sizes = [8, 8], strides = [1, 1]} : vector<16x8xf32> to vector<8x8xf32>
    %cst_59 = arith.constant dense<0.000000e+00> : vector<8x8xf32>
    %160 = tpu.matmul %155, %159, %cst_59 {dimension_numbers = #tpu.dot_dimension_numbers<[1], [0], [0], [1], [0, 0, 1, 1], [], []>} : vector<8x8xf32>, vector<8x8xf32>, vector<8x8xf32> -> vector<8x8xf32>
    %161 = vector.broadcast %158 : vector<8x1xf32> to vector<8x8xf32>
    %162 = arith.mulf %160, %161 : vector<8x8xf32>
    %163 = vector.extract_strided_slice %142 {offsets = [8, 0], sizes = [8, 8], strides = [1, 1]} : vector<16x8xf32> to vector<8x8xf32>
    %164 = vector.extract_strided_slice %143 {offsets = [8, 0], sizes = [8, 8], strides = [1, 1]} : vector<16x8xf32> to vector<8x8xf32>
    %cst_60 = arith.constant dense<0.000000e+00> : vector<8x8xf32>
    %165 = tpu.matmul %163, %164, %cst_60 {dimension_numbers = #tpu.dot_dimension_numbers<[1], [1], [0], [0], [0, 0, 1, 0], [], []>} : vector<8x8xf32>, vector<8x8xf32>, vector<8x8xf32> -> vector<8x8xf32>
    %166 = vector.extract_strided_slice %1 {offsets = [1, 0], sizes = [1, 8], strides = [1, 1]} : vector<2x8xf32> to vector<1x8xf32>
    %167 = vector.broadcast %166 : vector<1x8xf32> to vector<8x8xf32>
    %168 = arith.addf %165, %167 : vector<8x8xf32>
    %cst_61 = arith.constant dense<0xFF800000> : vector<8xf32>
    %169 = vector.multi_reduction <maximumf>, %168, %cst_61 [1] : vector<8x8xf32> to vector<8xf32>
    %170 = vector.shape_cast %169 : vector<8xf32> to vector<8x1xf32>
    %171 = vector.broadcast %170 : vector<8x1xf32> to vector<8x8xf32>
    %172 = arith.subf %168, %171 : vector<8x8xf32>
    %173 = math.exp %172 : vector<8x8xf32>
    %cst_62 = arith.constant dense<0.000000e+00> : vector<8xf32>
    %174 = vector.multi_reduction <add>, %173, %cst_62 [1] : vector<8x8xf32> to vector<8xf32>
    %175 = vector.shape_cast %174 : vector<8xf32> to vector<8x1xf32>
    %176 = tpu.reciprocal %175 : vector<8x1xf32> -> vector<8x1xf32>
    %177 = vector.extract_strided_slice %144 {offsets = [8, 0], sizes = [8, 8], strides = [1, 1]} : vector<16x8xf32> to vector<8x8xf32>
    %cst_63 = arith.constant dense<0.000000e+00> : vector<8x8xf32>
    %178 = tpu.matmul %173, %177, %cst_63 {dimension_numbers = #tpu.dot_dimension_numbers<[1], [0], [0], [1], [0, 0, 1, 1], [], []>} : vector<8x8xf32>, vector<8x8xf32>, vector<8x8xf32> -> vector<8x8xf32>
    %179 = vector.broadcast %176 : vector<8x1xf32> to vector<8x8xf32>
    %180 = arith.mulf %178, %179 : vector<8x8xf32>
    %181 = tpu.concatenate %45, %84, %123, %162 in 1 : vector<8x8xf32>, vector<8x8xf32>, vector<8x8xf32>, vector<8x8xf32> -> vector<8x32xf32>
    %182 = tpu.concatenate %63, %102, %141, %180 in 1 : vector<8x8xf32>, vector<8x8xf32>, vector<8x8xf32>, vector<8x8xf32> -> vector<8x32xf32>
    %183 = tpu.concatenate %181, %182 in 0 : vector<8x32xf32>, vector<8x32xf32> -> vector<16x32xf32>
    %cst_64 = arith.constant dense<0.000000e+00> : vector<16x32xf32>
    %184 = tpu.matmul %183, %4, %cst_64 {dimension_numbers = #tpu.dot_dimension_numbers<[1], [0], [0], [1], [0, 0, 1, 1], [], []>} : vector<16x32xf32>, vector<32x32xf32>, vector<16x32xf32> -> vector<16x32xf32>
    %185 = vector.broadcast %9 : vector<1x32xf32> to vector<16x32xf32>
    %186 = arith.addf %184, %185 : vector<16x32xf32>
    %187 = arith.addf %186, %18 : vector<16x32xf32>
    %cst_65 = arith.constant dense<0.000000e+00> : vector<16xf32>
    %188 = vector.multi_reduction <add>, %187, %cst_65 [1] : vector<16x32xf32> to vector<16xf32>
    %189 = vector.shape_cast %188 : vector<16xf32> to vector<16x1xf32>
    %cst_66 = arith.constant 3.200000e+01 : f32
    %190 = vector.broadcast %cst_66 : f32 to vector<16x1xf32>
    %191 = arith.divf %189, %190 : vector<16x1xf32>
    %192 = vector.broadcast %191 : vector<16x1xf32> to vector<16x32xf32>
    %193 = arith.subf %187, %192 : vector<16x32xf32>
    %194 = arith.mulf %193, %193 : vector<16x32xf32>
    %cst_67 = arith.constant dense<0.000000e+00> : vector<16xf32>
    %195 = vector.multi_reduction <add>, %194, %cst_67 [1] : vector<16x32xf32> to vector<16xf32>
    %196 = vector.shape_cast %195 : vector<16xf32> to vector<16x1xf32>
    %cst_68 = arith.constant 3.200000e+01 : f32
    %197 = vector.broadcast %cst_68 : f32 to vector<16x1xf32>
    %198 = arith.divf %196, %197 : vector<16x1xf32>
    %199 = vector.broadcast %191 : vector<16x1xf32> to vector<16x32xf32>
    %200 = arith.subf %187, %199 : vector<16x32xf32>
    %cst_69 = arith.constant 9.99999996E-13 : f32
    %201 = vector.broadcast %cst_69 : f32 to vector<16x1xf32>
    %202 = arith.addf %198, %201 : vector<16x1xf32>
    %203 = math.rsqrt %202 : vector<16x1xf32>
    %204 = vector.broadcast %203 : vector<16x1xf32> to vector<16x32xf32>
    %205 = arith.mulf %200, %204 : vector<16x32xf32>
    %206 = vector.broadcast %10 : vector<1x32xf32> to vector<16x32xf32>
    %207 = arith.mulf %205, %206 : vector<16x32xf32>
    %208 = vector.broadcast %11 : vector<1x32xf32> to vector<16x32xf32>
    %209 = arith.addf %207, %208 : vector<16x32xf32>
    %cst_70 = arith.constant dense<0.000000e+00> : vector<16x64xf32>
    %210 = tpu.matmul %209, %5, %cst_70 {dimension_numbers = #tpu.dot_dimension_numbers<[1], [0], [0], [1], [0, 0, 1, 1], [], []>} : vector<16x32xf32>, vector<32x64xf32>, vector<16x64xf32> -> vector<16x64xf32>
    %211 = vector.broadcast %12 : vector<1x64xf32> to vector<16x64xf32>
    %212 = arith.addf %210, %211 : vector<16x64xf32>
    %cst_71 = arith.constant 5.000000e-01 : f32
    %213 = vector.broadcast %cst_71 : f32 to vector<16x64xf32>
    %214 = arith.mulf %212, %213 : vector<16x64xf32>
    %cst_72 = arith.constant 1.41421354 : f32
    %215 = vector.broadcast %cst_72 : f32 to vector<16x64xf32>
    %216 = arith.divf %212, %215 : vector<16x64xf32>
    %cst_73 = arith.constant 0.000000e+00 : f32
    %217 = vector.broadcast %cst_73 : f32 to vector<16x64xf32>
    %218 = arith.cmpf oge, %216, %217 : vector<16x64xf32>
    %cst_74 = arith.constant 1.000000e+00 : f32
    %cst_75 = arith.constant -1.000000e+00 : f32
    %219 = vector.broadcast %cst_74 : f32 to vector<16x64xf32>
    %220 = vector.broadcast %cst_75 : f32 to vector<16x64xf32>
    %221 = arith.select %218, %219, %220 : vector<16x64xi1>, vector<16x64xf32>
    %222 = math.absf %216 : vector<16x64xf32>
    %cst_76 = arith.constant 0.327591091 : f32
    %223 = vector.broadcast %cst_76 : f32 to vector<16x64xf32>
    %224 = arith.mulf %223, %222 : vector<16x64xf32>
    %cst_77 = arith.constant 1.000000e+00 : f32
    %225 = vector.broadcast %cst_77 : f32 to vector<16x64xf32>
    %226 = arith.addf %225, %224 : vector<16x64xf32>
    %cst_78 = arith.constant 1.000000e+00 : f32
    %227 = vector.broadcast %cst_78 : f32 to vector<16x64xf32>
    %228 = arith.divf %227, %226 : vector<16x64xf32>
    %cst_79 = arith.constant 1.06140542 : f32
    %229 = vector.broadcast %cst_79 : f32 to vector<16x64xf32>
    %230 = arith.mulf %229, %228 : vector<16x64xf32>
    %cst_80 = arith.constant -1.45315206 : f32
    %231 = vector.broadcast %cst_80 : f32 to vector<16x64xf32>
    %232 = arith.addf %230, %231 : vector<16x64xf32>
    %233 = arith.mulf %232, %228 : vector<16x64xf32>
    %cst_81 = arith.constant 1.42141378 : f32
    %234 = vector.broadcast %cst_81 : f32 to vector<16x64xf32>
    %235 = arith.addf %233, %234 : vector<16x64xf32>
    %236 = arith.mulf %235, %228 : vector<16x64xf32>
    %cst_82 = arith.constant -0.284496725 : f32
    %237 = vector.broadcast %cst_82 : f32 to vector<16x64xf32>
    %238 = arith.addf %236, %237 : vector<16x64xf32>
    %239 = arith.mulf %238, %228 : vector<16x64xf32>
    %cst_83 = arith.constant 0.254829586 : f32
    %240 = vector.broadcast %cst_83 : f32 to vector<16x64xf32>
    %241 = arith.addf %239, %240 : vector<16x64xf32>
    %242 = arith.mulf %241, %228 : vector<16x64xf32>
    %cst_84 = arith.constant 0.000000e+00 : f32
    %243 = vector.broadcast %cst_84 : f32 to vector<16x64xf32>
    %244 = arith.subf %243, %222 : vector<16x64xf32>
    %245 = arith.mulf %244, %222 : vector<16x64xf32>
    %246 = math.exp %245 : vector<16x64xf32>
    %247 = arith.mulf %242, %246 : vector<16x64xf32>
    %cst_85 = arith.constant 1.000000e+00 : f32
    %248 = vector.broadcast %cst_85 : f32 to vector<16x64xf32>
    %249 = arith.subf %248, %247 : vector<16x64xf32>
    %250 = arith.mulf %221, %249 : vector<16x64xf32>
    %cst_86 = arith.constant 1.000000e+00 : f32
    %251 = vector.broadcast %cst_86 : f32 to vector<16x64xf32>
    %252 = arith.addf %251, %250 : vector<16x64xf32>
    %253 = arith.mulf %214, %252 : vector<16x64xf32>
    %cst_87 = arith.constant dense<0.000000e+00> : vector<16x32xf32>
    %254 = tpu.matmul %253, %6, %cst_87 {dimension_numbers = #tpu.dot_dimension_numbers<[1], [0], [0], [1], [0, 0, 1, 1], [], []>} : vector<16x64xf32>, vector<64x32xf32>, vector<16x32xf32> -> vector<16x32xf32>
    %255 = vector.broadcast %13 : vector<1x32xf32> to vector<16x32xf32>
    %256 = arith.addf %254, %255 : vector<16x32xf32>
    %257 = arith.addf %256, %209 : vector<16x32xf32>
    %cst_88 = arith.constant dense<0.000000e+00> : vector<16xf32>
    %258 = vector.multi_reduction <add>, %257, %cst_88 [1] : vector<16x32xf32> to vector<16xf32>
    %259 = vector.shape_cast %258 : vector<16xf32> to vector<16x1xf32>
    %cst_89 = arith.constant 3.200000e+01 : f32
    %260 = vector.broadcast %cst_89 : f32 to vector<16x1xf32>
    %261 = arith.divf %259, %260 : vector<16x1xf32>
    %262 = vector.broadcast %261 : vector<16x1xf32> to vector<16x32xf32>
    %263 = arith.subf %257, %262 : vector<16x32xf32>
    %264 = arith.mulf %263, %263 : vector<16x32xf32>
    %cst_90 = arith.constant dense<0.000000e+00> : vector<16xf32>
    %265 = vector.multi_reduction <add>, %264, %cst_90 [1] : vector<16x32xf32> to vector<16xf32>
    %266 = vector.shape_cast %265 : vector<16xf32> to vector<16x1xf32>
    %cst_91 = arith.constant 3.200000e+01 : f32
    %267 = vector.broadcast %cst_91 : f32 to vector<16x1xf32>
    %268 = arith.divf %266, %267 : vector<16x1xf32>
    %269 = vector.broadcast %261 : vector<16x1xf32> to vector<16x32xf32>
    %270 = arith.subf %257, %269 : vector<16x32xf32>
    %cst_92 = arith.constant 9.99999996E-13 : f32
    %271 = vector.broadcast %cst_92 : f32 to vector<16x1xf32>
    %272 = arith.addf %268, %271 : vector<16x1xf32>
    %273 = math.rsqrt %272 : vector<16x1xf32>
    %274 = vector.broadcast %273 : vector<16x1xf32> to vector<16x32xf32>
    %275 = arith.mulf %270, %274 : vector<16x32xf32>
    %276 = vector.broadcast %14 : vector<1x32xf32> to vector<16x32xf32>
    %277 = arith.mulf %275, %276 : vector<16x32xf32>
    %278 = vector.broadcast %15 : vector<1x32xf32> to vector<16x32xf32>
    %279 = arith.addf %277, %278 : vector<16x32xf32>
    %cst_93 = arith.constant dense<0.000000e+00> : vector<16x96xf32>
    %280 = tpu.matmul %279, %3, %cst_93 {dimension_numbers = #tpu.dot_dimension_numbers<[1], [0], [0], [1], [0, 0, 1, 1], [], []>} : vector<16x32xf32>, vector<32x96xf32>, vector<16x96xf32> -> vector<16x96xf32>
    %281 = vector.broadcast %8 : vector<1x96xf32> to vector<16x96xf32>
    %282 = arith.addf %280, %281 : vector<16x96xf32>
    %283 = vector.extract_strided_slice %282 {offsets = [0, 0], sizes = [16, 32], strides = [1, 1]} : vector<16x96xf32> to vector<16x32xf32>
    %284 = vector.extract_strided_slice %282 {offsets = [0, 32], sizes = [16, 32], strides = [1, 1]} : vector<16x96xf32> to vector<16x32xf32>
    %285 = vector.extract_strided_slice %282 {offsets = [0, 64], sizes = [16, 32], strides = [1, 1]} : vector<16x96xf32> to vector<16x32xf32>
    %286 = vector.extract_strided_slice %283 {offsets = [0, 0], sizes = [16, 8], strides = [1, 1]} : vector<16x32xf32> to vector<16x8xf32>
    %287 = vector.extract_strided_slice %284 {offsets = [0, 0], sizes = [16, 8], strides = [1, 1]} : vector<16x32xf32> to vector<16x8xf32>
    %288 = vector.extract_strided_slice %285 {offsets = [0, 0], sizes = [16, 8], strides = [1, 1]} : vector<16x32xf32> to vector<16x8xf32>
    %289 = vector.extract_strided_slice %286 {offsets = [0, 0], sizes = [8, 8], strides = [1, 1]} : vector<16x8xf32> to vector<8x8xf32>
    %290 = vector.extract_strided_slice %287 {offsets = [0, 0], sizes = [8, 8], strides = [1, 1]} : vector<16x8xf32> to vector<8x8xf32>
    %cst_94 = arith.constant dense<0.000000e+00> : vector<8x8xf32>
    %291 = tpu.matmul %289, %290, %cst_94 {dimension_numbers = #tpu.dot_dimension_numbers<[1], [1], [0], [0], [0, 0, 1, 0], [], []>} : vector<8x8xf32>, vector<8x8xf32>, vector<8x8xf32> -> vector<8x8xf32>
    %292 = vector.extract_strided_slice %1 {offsets = [0, 0], sizes = [1, 8], strides = [1, 1]} : vector<2x8xf32> to vector<1x8xf32>
    %293 = vector.broadcast %292 : vector<1x8xf32> to vector<8x8xf32>
    %294 = arith.addf %291, %293 : vector<8x8xf32>
    %cst_95 = arith.constant dense<0xFF800000> : vector<8xf32>
    %295 = vector.multi_reduction <maximumf>, %294, %cst_95 [1] : vector<8x8xf32> to vector<8xf32>
    %296 = vector.shape_cast %295 : vector<8xf32> to vector<8x1xf32>
    %297 = vector.broadcast %296 : vector<8x1xf32> to vector<8x8xf32>
    %298 = arith.subf %294, %297 : vector<8x8xf32>
    %299 = math.exp %298 : vector<8x8xf32>
    %cst_96 = arith.constant dense<0.000000e+00> : vector<8xf32>
    %300 = vector.multi_reduction <add>, %299, %cst_96 [1] : vector<8x8xf32> to vector<8xf32>
    %301 = vector.shape_cast %300 : vector<8xf32> to vector<8x1xf32>
    %302 = tpu.reciprocal %301 : vector<8x1xf32> -> vector<8x1xf32>
    %303 = vector.extract_strided_slice %288 {offsets = [0, 0], sizes = [8, 8], strides = [1, 1]} : vector<16x8xf32> to vector<8x8xf32>
    %cst_97 = arith.constant dense<0.000000e+00> : vector<8x8xf32>
    %304 = tpu.matmul %299, %303, %cst_97 {dimension_numbers = #tpu.dot_dimension_numbers<[1], [0], [0], [1], [0, 0, 1, 1], [], []>} : vector<8x8xf32>, vector<8x8xf32>, vector<8x8xf32> -> vector<8x8xf32>
    %305 = vector.broadcast %302 : vector<8x1xf32> to vector<8x8xf32>
    %306 = arith.mulf %304, %305 : vector<8x8xf32>
    %307 = vector.extract_strided_slice %286 {offsets = [8, 0], sizes = [8, 8], strides = [1, 1]} : vector<16x8xf32> to vector<8x8xf32>
    %308 = vector.extract_strided_slice %287 {offsets = [8, 0], sizes = [8, 8], strides = [1, 1]} : vector<16x8xf32> to vector<8x8xf32>
    %cst_98 = arith.constant dense<0.000000e+00> : vector<8x8xf32>
    %309 = tpu.matmul %307, %308, %cst_98 {dimension_numbers = #tpu.dot_dimension_numbers<[1], [1], [0], [0], [0, 0, 1, 0], [], []>} : vector<8x8xf32>, vector<8x8xf32>, vector<8x8xf32> -> vector<8x8xf32>
    %310 = vector.extract_strided_slice %1 {offsets = [1, 0], sizes = [1, 8], strides = [1, 1]} : vector<2x8xf32> to vector<1x8xf32>
    %311 = vector.broadcast %310 : vector<1x8xf32> to vector<8x8xf32>
    %312 = arith.addf %309, %311 : vector<8x8xf32>
    %cst_99 = arith.constant dense<0xFF800000> : vector<8xf32>
    %313 = vector.multi_reduction <maximumf>, %312, %cst_99 [1] : vector<8x8xf32> to vector<8xf32>
    %314 = vector.shape_cast %313 : vector<8xf32> to vector<8x1xf32>
    %315 = vector.broadcast %314 : vector<8x1xf32> to vector<8x8xf32>
    %316 = arith.subf %312, %315 : vector<8x8xf32>
    %317 = math.exp %316 : vector<8x8xf32>
    %cst_100 = arith.constant dense<0.000000e+00> : vector<8xf32>
    %318 = vector.multi_reduction <add>, %317, %cst_100 [1] : vector<8x8xf32> to vector<8xf32>
    %319 = vector.shape_cast %318 : vector<8xf32> to vector<8x1xf32>
    %320 = tpu.reciprocal %319 : vector<8x1xf32> -> vector<8x1xf32>
    %321 = vector.extract_strided_slice %288 {offsets = [8, 0], sizes = [8, 8], strides = [1, 1]} : vector<16x8xf32> to vector<8x8xf32>
    %cst_101 = arith.constant dense<0.000000e+00> : vector<8x8xf32>
    %322 = tpu.matmul %317, %321, %cst_101 {dimension_numbers = #tpu.dot_dimension_numbers<[1], [0], [0], [1], [0, 0, 1, 1], [], []>} : vector<8x8xf32>, vector<8x8xf32>, vector<8x8xf32> -> vector<8x8xf32>
    %323 = vector.broadcast %320 : vector<8x1xf32> to vector<8x8xf32>
    %324 = arith.mulf %322, %323 : vector<8x8xf32>
    %325 = vector.extract_strided_slice %283 {offsets = [0, 8], sizes = [16, 8], strides = [1, 1]} : vector<16x32xf32> to vector<16x8xf32>
    %326 = vector.extract_strided_slice %284 {offsets = [0, 8], sizes = [16, 8], strides = [1, 1]} : vector<16x32xf32> to vector<16x8xf32>
    %327 = vector.extract_strided_slice %285 {offsets = [0, 8], sizes = [16, 8], strides = [1, 1]} : vector<16x32xf32> to vector<16x8xf32>
    %328 = vector.extract_strided_slice %325 {offsets = [0, 0], sizes = [8, 8], strides = [1, 1]} : vector<16x8xf32> to vector<8x8xf32>
    %329 = vector.extract_strided_slice %326 {offsets = [0, 0], sizes = [8, 8], strides = [1, 1]} : vector<16x8xf32> to vector<8x8xf32>
    %cst_102 = arith.constant dense<0.000000e+00> : vector<8x8xf32>
    %330 = tpu.matmul %328, %329, %cst_102 {dimension_numbers = #tpu.dot_dimension_numbers<[1], [1], [0], [0], [0, 0, 1, 0], [], []>} : vector<8x8xf32>, vector<8x8xf32>, vector<8x8xf32> -> vector<8x8xf32>
    %331 = vector.extract_strided_slice %1 {offsets = [0, 0], sizes = [1, 8], strides = [1, 1]} : vector<2x8xf32> to vector<1x8xf32>
    %332 = vector.broadcast %331 : vector<1x8xf32> to vector<8x8xf32>
    %333 = arith.addf %330, %332 : vector<8x8xf32>
    %cst_103 = arith.constant dense<0xFF800000> : vector<8xf32>
    %334 = vector.multi_reduction <maximumf>, %333, %cst_103 [1] : vector<8x8xf32> to vector<8xf32>
    %335 = vector.shape_cast %334 : vector<8xf32> to vector<8x1xf32>
    %336 = vector.broadcast %335 : vector<8x1xf32> to vector<8x8xf32>
    %337 = arith.subf %333, %336 : vector<8x8xf32>
    %338 = math.exp %337 : vector<8x8xf32>
    %cst_104 = arith.constant dense<0.000000e+00> : vector<8xf32>
    %339 = vector.multi_reduction <add>, %338, %cst_104 [1] : vector<8x8xf32> to vector<8xf32>
    %340 = vector.shape_cast %339 : vector<8xf32> to vector<8x1xf32>
    %341 = tpu.reciprocal %340 : vector<8x1xf32> -> vector<8x1xf32>
    %342 = vector.extract_strided_slice %327 {offsets = [0, 0], sizes = [8, 8], strides = [1, 1]} : vector<16x8xf32> to vector<8x8xf32>
    %cst_105 = arith.constant dense<0.000000e+00> : vector<8x8xf32>
    %343 = tpu.matmul %338, %342, %cst_105 {dimension_numbers = #tpu.dot_dimension_numbers<[1], [0], [0], [1], [0, 0, 1, 1], [], []>} : vector<8x8xf32>, vector<8x8xf32>, vector<8x8xf32> -> vector<8x8xf32>
    %344 = vector.broadcast %341 : vector<8x1xf32> to vector<8x8xf32>
    %345 = arith.mulf %343, %344 : vector<8x8xf32>
    %346 = vector.extract_strided_slice %325 {offsets = [8, 0], sizes = [8, 8], strides = [1, 1]} : vector<16x8xf32> to vector<8x8xf32>
    %347 = vector.extract_strided_slice %326 {offsets = [8, 0], sizes = [8, 8], strides = [1, 1]} : vector<16x8xf32> to vector<8x8xf32>
    %cst_106 = arith.constant dense<0.000000e+00> : vector<8x8xf32>
    %348 = tpu.matmul %346, %347, %cst_106 {dimension_numbers = #tpu.dot_dimension_numbers<[1], [1], [0], [0], [0, 0, 1, 0], [], []>} : vector<8x8xf32>, vector<8x8xf32>, vector<8x8xf32> -> vector<8x8xf32>
    %349 = vector.extract_strided_slice %1 {offsets = [1, 0], sizes = [1, 8], strides = [1, 1]} : vector<2x8xf32> to vector<1x8xf32>
    %350 = vector.broadcast %349 : vector<1x8xf32> to vector<8x8xf32>
    %351 = arith.addf %348, %350 : vector<8x8xf32>
    %cst_107 = arith.constant dense<0xFF800000> : vector<8xf32>
    %352 = vector.multi_reduction <maximumf>, %351, %cst_107 [1] : vector<8x8xf32> to vector<8xf32>
    %353 = vector.shape_cast %352 : vector<8xf32> to vector<8x1xf32>
    %354 = vector.broadcast %353 : vector<8x1xf32> to vector<8x8xf32>
    %355 = arith.subf %351, %354 : vector<8x8xf32>
    %356 = math.exp %355 : vector<8x8xf32>
    %cst_108 = arith.constant dense<0.000000e+00> : vector<8xf32>
    %357 = vector.multi_reduction <add>, %356, %cst_108 [1] : vector<8x8xf32> to vector<8xf32>
    %358 = vector.shape_cast %357 : vector<8xf32> to vector<8x1xf32>
    %359 = tpu.reciprocal %358 : vector<8x1xf32> -> vector<8x1xf32>
    %360 = vector.extract_strided_slice %327 {offsets = [8, 0], sizes = [8, 8], strides = [1, 1]} : vector<16x8xf32> to vector<8x8xf32>
    %cst_109 = arith.constant dense<0.000000e+00> : vector<8x8xf32>
    %361 = tpu.matmul %356, %360, %cst_109 {dimension_numbers = #tpu.dot_dimension_numbers<[1], [0], [0], [1], [0, 0, 1, 1], [], []>} : vector<8x8xf32>, vector<8x8xf32>, vector<8x8xf32> -> vector<8x8xf32>
    %362 = vector.broadcast %359 : vector<8x1xf32> to vector<8x8xf32>
    %363 = arith.mulf %361, %362 : vector<8x8xf32>
    %364 = vector.extract_strided_slice %283 {offsets = [0, 16], sizes = [16, 8], strides = [1, 1]} : vector<16x32xf32> to vector<16x8xf32>
    %365 = vector.extract_strided_slice %284 {offsets = [0, 16], sizes = [16, 8], strides = [1, 1]} : vector<16x32xf32> to vector<16x8xf32>
    %366 = vector.extract_strided_slice %285 {offsets = [0, 16], sizes = [16, 8], strides = [1, 1]} : vector<16x32xf32> to vector<16x8xf32>
    %367 = vector.extract_strided_slice %364 {offsets = [0, 0], sizes = [8, 8], strides = [1, 1]} : vector<16x8xf32> to vector<8x8xf32>
    %368 = vector.extract_strided_slice %365 {offsets = [0, 0], sizes = [8, 8], strides = [1, 1]} : vector<16x8xf32> to vector<8x8xf32>
    %cst_110 = arith.constant dense<0.000000e+00> : vector<8x8xf32>
    %369 = tpu.matmul %367, %368, %cst_110 {dimension_numbers = #tpu.dot_dimension_numbers<[1], [1], [0], [0], [0, 0, 1, 0], [], []>} : vector<8x8xf32>, vector<8x8xf32>, vector<8x8xf32> -> vector<8x8xf32>
    %370 = vector.extract_strided_slice %1 {offsets = [0, 0], sizes = [1, 8], strides = [1, 1]} : vector<2x8xf32> to vector<1x8xf32>
    %371 = vector.broadcast %370 : vector<1x8xf32> to vector<8x8xf32>
    %372 = arith.addf %369, %371 : vector<8x8xf32>
    %cst_111 = arith.constant dense<0xFF800000> : vector<8xf32>
    %373 = vector.multi_reduction <maximumf>, %372, %cst_111 [1] : vector<8x8xf32> to vector<8xf32>
    %374 = vector.shape_cast %373 : vector<8xf32> to vector<8x1xf32>
    %375 = vector.broadcast %374 : vector<8x1xf32> to vector<8x8xf32>
    %376 = arith.subf %372, %375 : vector<8x8xf32>
    %377 = math.exp %376 : vector<8x8xf32>
    %cst_112 = arith.constant dense<0.000000e+00> : vector<8xf32>
    %378 = vector.multi_reduction <add>, %377, %cst_112 [1] : vector<8x8xf32> to vector<8xf32>
    %379 = vector.shape_cast %378 : vector<8xf32> to vector<8x1xf32>
    %380 = tpu.reciprocal %379 : vector<8x1xf32> -> vector<8x1xf32>
    %381 = vector.extract_strided_slice %366 {offsets = [0, 0], sizes = [8, 8], strides = [1, 1]} : vector<16x8xf32> to vector<8x8xf32>
    %cst_113 = arith.constant dense<0.000000e+00> : vector<8x8xf32>
    %382 = tpu.matmul %377, %381, %cst_113 {dimension_numbers = #tpu.dot_dimension_numbers<[1], [0], [0], [1], [0, 0, 1, 1], [], []>} : vector<8x8xf32>, vector<8x8xf32>, vector<8x8xf32> -> vector<8x8xf32>
    %383 = vector.broadcast %380 : vector<8x1xf32> to vector<8x8xf32>
    %384 = arith.mulf %382, %383 : vector<8x8xf32>
    %385 = vector.extract_strided_slice %364 {offsets = [8, 0], sizes = [8, 8], strides = [1, 1]} : vector<16x8xf32> to vector<8x8xf32>
    %386 = vector.extract_strided_slice %365 {offsets = [8, 0], sizes = [8, 8], strides = [1, 1]} : vector<16x8xf32> to vector<8x8xf32>
    %cst_114 = arith.constant dense<0.000000e+00> : vector<8x8xf32>
    %387 = tpu.matmul %385, %386, %cst_114 {dimension_numbers = #tpu.dot_dimension_numbers<[1], [1], [0], [0], [0, 0, 1, 0], [], []>} : vector<8x8xf32>, vector<8x8xf32>, vector<8x8xf32> -> vector<8x8xf32>
    %388 = vector.extract_strided_slice %1 {offsets = [1, 0], sizes = [1, 8], strides = [1, 1]} : vector<2x8xf32> to vector<1x8xf32>
    %389 = vector.broadcast %388 : vector<1x8xf32> to vector<8x8xf32>
    %390 = arith.addf %387, %389 : vector<8x8xf32>
    %cst_115 = arith.constant dense<0xFF800000> : vector<8xf32>
    %391 = vector.multi_reduction <maximumf>, %390, %cst_115 [1] : vector<8x8xf32> to vector<8xf32>
    %392 = vector.shape_cast %391 : vector<8xf32> to vector<8x1xf32>
    %393 = vector.broadcast %392 : vector<8x1xf32> to vector<8x8xf32>
    %394 = arith.subf %390, %393 : vector<8x8xf32>
    %395 = math.exp %394 : vector<8x8xf32>
    %cst_116 = arith.constant dense<0.000000e+00> : vector<8xf32>
    %396 = vector.multi_reduction <add>, %395, %cst_116 [1] : vector<8x8xf32> to vector<8xf32>
    %397 = vector.shape_cast %396 : vector<8xf32> to vector<8x1xf32>
    %398 = tpu.reciprocal %397 : vector<8x1xf32> -> vector<8x1xf32>
    %399 = vector.extract_strided_slice %366 {offsets = [8, 0], sizes = [8, 8], strides = [1, 1]} : vector<16x8xf32> to vector<8x8xf32>
    %cst_117 = arith.constant dense<0.000000e+00> : vector<8x8xf32>
    %400 = tpu.matmul %395, %399, %cst_117 {dimension_numbers = #tpu.dot_dimension_numbers<[1], [0], [0], [1], [0, 0, 1, 1], [], []>} : vector<8x8xf32>, vector<8x8xf32>, vector<8x8xf32> -> vector<8x8xf32>
    %401 = vector.broadcast %398 : vector<8x1xf32> to vector<8x8xf32>
    %402 = arith.mulf %400, %401 : vector<8x8xf32>
    %403 = vector.extract_strided_slice %283 {offsets = [0, 24], sizes = [16, 8], strides = [1, 1]} : vector<16x32xf32> to vector<16x8xf32>
    %404 = vector.extract_strided_slice %284 {offsets = [0, 24], sizes = [16, 8], strides = [1, 1]} : vector<16x32xf32> to vector<16x8xf32>
    %405 = vector.extract_strided_slice %285 {offsets = [0, 24], sizes = [16, 8], strides = [1, 1]} : vector<16x32xf32> to vector<16x8xf32>
    %406 = vector.extract_strided_slice %403 {offsets = [0, 0], sizes = [8, 8], strides = [1, 1]} : vector<16x8xf32> to vector<8x8xf32>
    %407 = vector.extract_strided_slice %404 {offsets = [0, 0], sizes = [8, 8], strides = [1, 1]} : vector<16x8xf32> to vector<8x8xf32>
    %cst_118 = arith.constant dense<0.000000e+00> : vector<8x8xf32>
    %408 = tpu.matmul %406, %407, %cst_118 {dimension_numbers = #tpu.dot_dimension_numbers<[1], [1], [0], [0], [0, 0, 1, 0], [], []>} : vector<8x8xf32>, vector<8x8xf32>, vector<8x8xf32> -> vector<8x8xf32>
    %409 = vector.extract_strided_slice %1 {offsets = [0, 0], sizes = [1, 8], strides = [1, 1]} : vector<2x8xf32> to vector<1x8xf32>
    %410 = vector.broadcast %409 : vector<1x8xf32> to vector<8x8xf32>
    %411 = arith.addf %408, %410 : vector<8x8xf32>
    %cst_119 = arith.constant dense<0xFF800000> : vector<8xf32>
    %412 = vector.multi_reduction <maximumf>, %411, %cst_119 [1] : vector<8x8xf32> to vector<8xf32>
    %413 = vector.shape_cast %412 : vector<8xf32> to vector<8x1xf32>
    %414 = vector.broadcast %413 : vector<8x1xf32> to vector<8x8xf32>
    %415 = arith.subf %411, %414 : vector<8x8xf32>
    %416 = math.exp %415 : vector<8x8xf32>
    %cst_120 = arith.constant dense<0.000000e+00> : vector<8xf32>
    %417 = vector.multi_reduction <add>, %416, %cst_120 [1] : vector<8x8xf32> to vector<8xf32>
    %418 = vector.shape_cast %417 : vector<8xf32> to vector<8x1xf32>
    %419 = tpu.reciprocal %418 : vector<8x1xf32> -> vector<8x1xf32>
    %420 = vector.extract_strided_slice %405 {offsets = [0, 0], sizes = [8, 8], strides = [1, 1]} : vector<16x8xf32> to vector<8x8xf32>
    %cst_121 = arith.constant dense<0.000000e+00> : vector<8x8xf32>
    %421 = tpu.matmul %416, %420, %cst_121 {dimension_numbers = #tpu.dot_dimension_numbers<[1], [0], [0], [1], [0, 0, 1, 1], [], []>} : vector<8x8xf32>, vector<8x8xf32>, vector<8x8xf32> -> vector<8x8xf32>
    %422 = vector.broadcast %419 : vector<8x1xf32> to vector<8x8xf32>
    %423 = arith.mulf %421, %422 : vector<8x8xf32>
    %424 = vector.extract_strided_slice %403 {offsets = [8, 0], sizes = [8, 8], strides = [1, 1]} : vector<16x8xf32> to vector<8x8xf32>
    %425 = vector.extract_strided_slice %404 {offsets = [8, 0], sizes = [8, 8], strides = [1, 1]} : vector<16x8xf32> to vector<8x8xf32>
    %cst_122 = arith.constant dense<0.000000e+00> : vector<8x8xf32>
    %426 = tpu.matmul %424, %425, %cst_122 {dimension_numbers = #tpu.dot_dimension_numbers<[1], [1], [0], [0], [0, 0, 1, 0], [], []>} : vector<8x8xf32>, vector<8x8xf32>, vector<8x8xf32> -> vector<8x8xf32>
    %427 = vector.extract_strided_slice %1 {offsets = [1, 0], sizes = [1, 8], strides = [1, 1]} : vector<2x8xf32> to vector<1x8xf32>
    %428 = vector.broadcast %427 : vector<1x8xf32> to vector<8x8xf32>
    %429 = arith.addf %426, %428 : vector<8x8xf32>
    %cst_123 = arith.constant dense<0xFF800000> : vector<8xf32>
    %430 = vector.multi_reduction <maximumf>, %429, %cst_123 [1] : vector<8x8xf32> to vector<8xf32>
    %431 = vector.shape_cast %430 : vector<8xf32> to vector<8x1xf32>
    %432 = vector.broadcast %431 : vector<8x1xf32> to vector<8x8xf32>
    %433 = arith.subf %429, %432 : vector<8x8xf32>
    %434 = math.exp %433 : vector<8x8xf32>
    %cst_124 = arith.constant dense<0.000000e+00> : vector<8xf32>
    %435 = vector.multi_reduction <add>, %434, %cst_124 [1] : vector<8x8xf32> to vector<8xf32>
    %436 = vector.shape_cast %435 : vector<8xf32> to vector<8x1xf32>
    %437 = tpu.reciprocal %436 : vector<8x1xf32> -> vector<8x1xf32>
    %438 = vector.extract_strided_slice %405 {offsets = [8, 0], sizes = [8, 8], strides = [1, 1]} : vector<16x8xf32> to vector<8x8xf32>
    %cst_125 = arith.constant dense<0.000000e+00> : vector<8x8xf32>
    %439 = tpu.matmul %434, %438, %cst_125 {dimension_numbers = #tpu.dot_dimension_numbers<[1], [0], [0], [1], [0, 0, 1, 1], [], []>} : vector<8x8xf32>, vector<8x8xf32>, vector<8x8xf32> -> vector<8x8xf32>
    %440 = vector.broadcast %437 : vector<8x1xf32> to vector<8x8xf32>
    %441 = arith.mulf %439, %440 : vector<8x8xf32>
    %442 = tpu.concatenate %306, %345, %384, %423 in 1 : vector<8x8xf32>, vector<8x8xf32>, vector<8x8xf32>, vector<8x8xf32> -> vector<8x32xf32>
    %443 = tpu.concatenate %324, %363, %402, %441 in 1 : vector<8x8xf32>, vector<8x8xf32>, vector<8x8xf32>, vector<8x8xf32> -> vector<8x32xf32>
    %444 = tpu.concatenate %442, %443 in 0 : vector<8x32xf32>, vector<8x32xf32> -> vector<16x32xf32>
    %cst_126 = arith.constant dense<0.000000e+00> : vector<16x32xf32>
    %445 = tpu.matmul %444, %4, %cst_126 {dimension_numbers = #tpu.dot_dimension_numbers<[1], [0], [0], [1], [0, 0, 1, 1], [], []>} : vector<16x32xf32>, vector<32x32xf32>, vector<16x32xf32> -> vector<16x32xf32>
    %446 = vector.broadcast %9 : vector<1x32xf32> to vector<16x32xf32>
    %447 = arith.addf %445, %446 : vector<16x32xf32>
    %448 = arith.addf %447, %279 : vector<16x32xf32>
    %cst_127 = arith.constant dense<0.000000e+00> : vector<16xf32>
    %449 = vector.multi_reduction <add>, %448, %cst_127 [1] : vector<16x32xf32> to vector<16xf32>
    %450 = vector.shape_cast %449 : vector<16xf32> to vector<16x1xf32>
    %cst_128 = arith.constant 3.200000e+01 : f32
    %451 = vector.broadcast %cst_128 : f32 to vector<16x1xf32>
    %452 = arith.divf %450, %451 : vector<16x1xf32>
    %453 = vector.broadcast %452 : vector<16x1xf32> to vector<16x32xf32>
    %454 = arith.subf %448, %453 : vector<16x32xf32>
    %455 = arith.mulf %454, %454 : vector<16x32xf32>
    %cst_129 = arith.constant dense<0.000000e+00> : vector<16xf32>
    %456 = vector.multi_reduction <add>, %455, %cst_129 [1] : vector<16x32xf32> to vector<16xf32>
    %457 = vector.shape_cast %456 : vector<16xf32> to vector<16x1xf32>
    %cst_130 = arith.constant 3.200000e+01 : f32
    %458 = vector.broadcast %cst_130 : f32 to vector<16x1xf32>
    %459 = arith.divf %457, %458 : vector<16x1xf32>
    %460 = vector.broadcast %452 : vector<16x1xf32> to vector<16x32xf32>
    %461 = arith.subf %448, %460 : vector<16x32xf32>
    %cst_131 = arith.constant 9.99999996E-13 : f32
    %462 = vector.broadcast %cst_131 : f32 to vector<16x1xf32>
    %463 = arith.addf %459, %462 : vector<16x1xf32>
    %464 = math.rsqrt %463 : vector<16x1xf32>
    %465 = vector.broadcast %464 : vector<16x1xf32> to vector<16x32xf32>
    %466 = arith.mulf %461, %465 : vector<16x32xf32>
    %467 = vector.broadcast %10 : vector<1x32xf32> to vector<16x32xf32>
    %468 = arith.mulf %466, %467 : vector<16x32xf32>
    %469 = vector.broadcast %11 : vector<1x32xf32> to vector<16x32xf32>
    %470 = arith.addf %468, %469 : vector<16x32xf32>
    %cst_132 = arith.constant dense<0.000000e+00> : vector<16x64xf32>
    %471 = tpu.matmul %470, %5, %cst_132 {dimension_numbers = #tpu.dot_dimension_numbers<[1], [0], [0], [1], [0, 0, 1, 1], [], []>} : vector<16x32xf32>, vector<32x64xf32>, vector<16x64xf32> -> vector<16x64xf32>
    %472 = vector.broadcast %12 : vector<1x64xf32> to vector<16x64xf32>
    %473 = arith.addf %471, %472 : vector<16x64xf32>
    %cst_133 = arith.constant 5.000000e-01 : f32
    %474 = vector.broadcast %cst_133 : f32 to vector<16x64xf32>
    %475 = arith.mulf %473, %474 : vector<16x64xf32>
    %cst_134 = arith.constant 1.41421354 : f32
    %476 = vector.broadcast %cst_134 : f32 to vector<16x64xf32>
    %477 = arith.divf %473, %476 : vector<16x64xf32>
    %cst_135 = arith.constant 0.000000e+00 : f32
    %478 = vector.broadcast %cst_135 : f32 to vector<16x64xf32>
    %479 = arith.cmpf oge, %477, %478 : vector<16x64xf32>
    %cst_136 = arith.constant 1.000000e+00 : f32
    %cst_137 = arith.constant -1.000000e+00 : f32
    %480 = vector.broadcast %cst_136 : f32 to vector<16x64xf32>
    %481 = vector.broadcast %cst_137 : f32 to vector<16x64xf32>
    %482 = arith.select %479, %480, %481 : vector<16x64xi1>, vector<16x64xf32>
    %483 = math.absf %477 : vector<16x64xf32>
    %cst_138 = arith.constant 0.327591091 : f32
    %484 = vector.broadcast %cst_138 : f32 to vector<16x64xf32>
    %485 = arith.mulf %484, %483 : vector<16x64xf32>
    %cst_139 = arith.constant 1.000000e+00 : f32
    %486 = vector.broadcast %cst_139 : f32 to vector<16x64xf32>
    %487 = arith.addf %486, %485 : vector<16x64xf32>
    %cst_140 = arith.constant 1.000000e+00 : f32
    %488 = vector.broadcast %cst_140 : f32 to vector<16x64xf32>
    %489 = arith.divf %488, %487 : vector<16x64xf32>
    %cst_141 = arith.constant 1.06140542 : f32
    %490 = vector.broadcast %cst_141 : f32 to vector<16x64xf32>
    %491 = arith.mulf %490, %489 : vector<16x64xf32>
    %cst_142 = arith.constant -1.45315206 : f32
    %492 = vector.broadcast %cst_142 : f32 to vector<16x64xf32>
    %493 = arith.addf %491, %492 : vector<16x64xf32>
    %494 = arith.mulf %493, %489 : vector<16x64xf32>
    %cst_143 = arith.constant 1.42141378 : f32
    %495 = vector.broadcast %cst_143 : f32 to vector<16x64xf32>
    %496 = arith.addf %494, %495 : vector<16x64xf32>
    %497 = arith.mulf %496, %489 : vector<16x64xf32>
    %cst_144 = arith.constant -0.284496725 : f32
    %498 = vector.broadcast %cst_144 : f32 to vector<16x64xf32>
    %499 = arith.addf %497, %498 : vector<16x64xf32>
    %500 = arith.mulf %499, %489 : vector<16x64xf32>
    %cst_145 = arith.constant 0.254829586 : f32
    %501 = vector.broadcast %cst_145 : f32 to vector<16x64xf32>
    %502 = arith.addf %500, %501 : vector<16x64xf32>
    %503 = arith.mulf %502, %489 : vector<16x64xf32>
    %cst_146 = arith.constant 0.000000e+00 : f32
    %504 = vector.broadcast %cst_146 : f32 to vector<16x64xf32>
    %505 = arith.subf %504, %483 : vector<16x64xf32>
    %506 = arith.mulf %505, %483 : vector<16x64xf32>
    %507 = math.exp %506 : vector<16x64xf32>
    %508 = arith.mulf %503, %507 : vector<16x64xf32>
    %cst_147 = arith.constant 1.000000e+00 : f32
    %509 = vector.broadcast %cst_147 : f32 to vector<16x64xf32>
    %510 = arith.subf %509, %508 : vector<16x64xf32>
    %511 = arith.mulf %482, %510 : vector<16x64xf32>
    %cst_148 = arith.constant 1.000000e+00 : f32
    %512 = vector.broadcast %cst_148 : f32 to vector<16x64xf32>
    %513 = arith.addf %512, %511 : vector<16x64xf32>
    %514 = arith.mulf %475, %513 : vector<16x64xf32>
    %cst_149 = arith.constant dense<0.000000e+00> : vector<16x32xf32>
    %515 = tpu.matmul %514, %6, %cst_149 {dimension_numbers = #tpu.dot_dimension_numbers<[1], [0], [0], [1], [0, 0, 1, 1], [], []>} : vector<16x64xf32>, vector<64x32xf32>, vector<16x32xf32> -> vector<16x32xf32>
    %516 = vector.broadcast %13 : vector<1x32xf32> to vector<16x32xf32>
    %517 = arith.addf %515, %516 : vector<16x32xf32>
    %518 = arith.addf %517, %470 : vector<16x32xf32>
    %cst_150 = arith.constant dense<0.000000e+00> : vector<16xf32>
    %519 = vector.multi_reduction <add>, %518, %cst_150 [1] : vector<16x32xf32> to vector<16xf32>
    %520 = vector.shape_cast %519 : vector<16xf32> to vector<16x1xf32>
    %cst_151 = arith.constant 3.200000e+01 : f32
    %521 = vector.broadcast %cst_151 : f32 to vector<16x1xf32>
    %522 = arith.divf %520, %521 : vector<16x1xf32>
    %523 = vector.broadcast %522 : vector<16x1xf32> to vector<16x32xf32>
    %524 = arith.subf %518, %523 : vector<16x32xf32>
    %525 = arith.mulf %524, %524 : vector<16x32xf32>
    %cst_152 = arith.constant dense<0.000000e+00> : vector<16xf32>
    %526 = vector.multi_reduction <add>, %525, %cst_152 [1] : vector<16x32xf32> to vector<16xf32>
    %527 = vector.shape_cast %526 : vector<16xf32> to vector<16x1xf32>
    %cst_153 = arith.constant 3.200000e+01 : f32
    %528 = vector.broadcast %cst_153 : f32 to vector<16x1xf32>
    %529 = arith.divf %527, %528 : vector<16x1xf32>
    %530 = vector.broadcast %522 : vector<16x1xf32> to vector<16x32xf32>
    %531 = arith.subf %518, %530 : vector<16x32xf32>
    %cst_154 = arith.constant 9.99999996E-13 : f32
    %532 = vector.broadcast %cst_154 : f32 to vector<16x1xf32>
    %533 = arith.addf %529, %532 : vector<16x1xf32>
    %534 = math.rsqrt %533 : vector<16x1xf32>
    %535 = vector.broadcast %534 : vector<16x1xf32> to vector<16x32xf32>
    %536 = arith.mulf %531, %535 : vector<16x32xf32>
    %537 = vector.broadcast %14 : vector<1x32xf32> to vector<16x32xf32>
    %538 = arith.mulf %536, %537 : vector<16x32xf32>
    %539 = vector.broadcast %15 : vector<1x32xf32> to vector<16x32xf32>
    %540 = arith.addf %538, %539 : vector<16x32xf32>
    %c0_155 = arith.constant 0 : index
    %c0_156 = arith.constant 0 : index
    %541 = vector.load %arg16[%c0_155, %c0_156] : memref<16x32xf32, #tpu.memory_space<vmem>>, vector<16x32xf32>
    tpu.vector_store %arg16[%c0_155, %c0_156], %540 {strides = array<i32>} : memref<16x32xf32, #tpu.memory_space<vmem>>, vector<16x32xf32>,
    return
  }
}

</mosaic_0001>

<bundles_post_ra>
// kernel: albert_encoder.1
= control target key start
LH: loop header
LB: loop body
LE: loop exit
PB: predicated region body
PF: predicated region fallthrough
CT: control target
= control target key end

     0   :  { %s5323_s0 = inlined_call_operand.hbm [shape: f32[16,16], index: 0, kind: input, shape index: {}]   ;;  %s5324_s1 = inlined_call_operand.vmem [shape: f32[2,8], index: 1, kind: input, shape index: {}]   ;;  %s5325_s2 = inlined_call_operand.hbm [shape: f32[16,32], index: 2, kind: input, shape index: {}]   ;;  %s5326_s3 = inlined_call_operand.vmem [shape: f32[1,32], index: 3, kind: input, shape index: {}]   ;;  %s5327_s4 = inlined_call_operand.vmem [shape: f32[32,96], index: 4, kind: input, shape index: {}]   ;;  %s5328_s5 = inlined_call_operand.vmem [shape: f32[1,96], index: 5, kind: input, shape index: {}]   ;;  %s5329_s6 = inlined_call_operand.vmem [shape: f32[32,32], index: 6, kind: input, shape index: {}]   ;;  %s5330_s7 = inlined_call_operand.vmem [shape: f32[1,32], index: 7, kind: input, shape index: {}]   ;;  %s5331_s8 = inlined_call_operand.vmem [shape: f32[1,32], index: 8, kind: input, shape index: {}]   ;;  %s5332_s9 = inlined_call_operand.vmem [shape: f32[1,32], index: 9, kind: input, shape index: {}]   ;;  %s5333_s10 = inlined_call_operand.vmem [shape: f32[32,64], index: 10, kind: input, shape index: {}]   ;;  %s5334_s11 = inlined_call_operand.vmem [shape: f32[1,64], index: 11, kind: input, shape index: {}]   ;;  %s5335_s12 = inlined_call_operand.vmem [shape: f32[64,32], index: 12, kind: input, shape index: {}]   ;;  %s5336_s13 = inlined_call_operand.vmem [shape: f32[1,32], index: 13, kind: input, shape index: {}]   ;;  %s5337_s14 = inlined_call_operand.vmem [shape: f32[1,32], index: 14, kind: input, shape index: {}]   ;;  %s5338_s15 = inlined_call_operand.vmem [shape: f32[1,32], index: 15, kind: input, shape index: {}]   ;;  %s5339_s16 = inlined_call_operand.hbm [shape: f32[16,32], index: 16, kind: output, shape index: {}]  }
   0x1   :  { %5340 = sst [smem:[#allocation11_spill]] %s5323_s0 }
   0x2   :  { %21 = vsyncpa [#allocation3], 0 }
   0x3   :  { %22 = vsyncpa [#allocation6], 0 }
   0x4   :  { %23 = vsyncpa [#allocation4], 0  ;;  %s4519_s21 = smov [#allocation2]  }
   0x5   :  { %s29_s22 = sshll.u32 %s4519_s21, 4  ;;  %s30_s22 = int_to_ptr.vmem [resolvable:$true] %s29_s22 }
   0x6   :  { %s4461_s23 = scalar_lea.vmem %s30_s22, 256  ;;  %p4466_p1 = scmp.lt.s32.totalorder %s30_s22, %s30_s22 }
   0x7   :  { %p4462_p0 = scmp.ne.s32.totalorder %s30_s22, %s4461_s23  ;;  %p4467_p2 = scmp.lt.s32.totalorder %s4461_s23, %s4461_s23 }
   0x9   :  { %p4468_p3 = por %p4467_p2, %p4466_p1 }
   0xb   :  { %p4469_p4 = pnand %p4468_p3, %p4462_p0 }
   0xd   :  { %4472 = shalt.err (!%p4469_p4)
}
   0xe   :  { %s4520_s24 = smov 128   ;;  %s4521_s25 = smov 8  }
   0xf   :  { %s5341_s28 = sld [smem:[#allocation11_spill]]  ;;  %s4522_s29 = smov [#allocation5]  }
  0x10   :  { %s43_s30 = sshll.u32 %s4522_s29, 4  ;;  %s44_s30 = int_to_ptr.vmem [resolvable:$true] %s43_s30 }
  0x11   :  { %s4481_s0 = scalar_lea.vmem %s44_s30, 256  ;;  %p4486_p6 = scmp.lt.s32.totalorder %s44_s30, %s44_s30 }
  0x12   :  { %p4482_p5 = scmp.ne.s32.totalorder %s44_s30, %s4481_s0  ;;  %p4487_p7 = scmp.lt.s32.totalorder %s4481_s0, %s4481_s0 }
  0x14   :  { %p4488_p8 = por %p4487_p7, %p4486_p6 }
  0x15   :  { %35 = dma.hbm_to_vmem [thread:$0]  %s5341_s28, 256, %s30_s22, [#allocation3], %s4520_s24, %s4520_s24, %s4521_s25  }
  0x16   :  { %p4489_p9 = pnand %p4488_p8, %p4482_p5 }
  0x18   :  { %4492 = shalt.err (!%p4489_p9)
}
  0x19   :  { %49 = dma.hbm_to_vmem [thread:$0]  %s5325_s2, 256, %s44_s30, [#allocation6], %s4520_s24, %s4520_s24, %s4521_s25  }
  0x1a   :  { %4513 = dma.done.wait [#allocation3], 256  }
  0x1b   :  { %4514 = vsyncadd [#allocation3], 4294967040 }
  0x1c   :  { %4515 = dma.done.wait [#allocation6], 256  }
  0x1d   :  { %4516 = vsyncadd [#allocation6], 4294967040  ;;  %vm122_vm0 = vcmask 130048   ;;  %v86_v0 = vld [vmem:[#allocation5 + $0x8] sm:$0xff]  ;;  %v85_v1 = vld [vmem:[#allocation5] sm:$0xff]  ;;  %vm210_vm1 = vcmask 261120   ;;  %v292_v34 = vlaneseq }
  0x1e   :  { %v82_v2 = vld [vmem:[#allocation2] sm:$0xff]  ;;  %4065 = vmatprep.subr.mxu0 %v86_v0  ;;  %v83_v3 = vld [vmem:[#allocation2 + $0x8] sm:$0xff]  ;;  %v4641_v4 = vld [vmem:[%s5327_s4 + $0x18] sm:$0xff]  ;;  %v4523_v13 = vmov 0.0   ;;  %vm4524_vm2 = vmmov 0   ;;  %s4525_s30 = smov 64  }
  0x1f   :  { %4069 = vmatprep.mubr.msk.f32.mxu0 %vm122_vm0, %v82_v2  ;;  %4066 = vmatpush3.msra.mxu0 %v86_v0  ;;  %v4649_v5 = vld [vmem:[%s5327_s4 + $0x10] sm:$0xff]  ;;  %v4656_v6 = vld [vmem:[%s5327_s4 + $0x8] sm:$0xff]  ;;  %v4663_v7 = vld [vmem:[%s5327_s4] sm:$0xff]  ;;  %s4526_s0 = smov 96   ;;  %s4528_s17 = smov 120   ;;  %vm299_vm3 = vcmask 64512  }
  0x20   :  { %4067 = vmatprep.subr.mxu0 %v85_v1  ;;  %v3866_v9 = vld [vmem:[%s5326_s3] ss:$0 sm:$0xff]  ;;  %4088 = vmatprep.subr.mxu1 %v4523_v13  ;;  %s4529_s18 = smov 80   ;;  %s4530_s19 = smov 112   ;;  %v293_v35 = vshrl.u32 %v292_v34, 7  ;;  %vm1633_vm4 = vcmask 195584  }
  0x21   :  { %4068 = vmatpush3.msra.mxu0 %v85_v1  ;;  %4090 = vmatprep.mubr.msk.f32.mxu1 %vm4524_vm2, %v4523_v13  ;;  %v4687_v15 = vld [vmem:[%s5328_s5] ss:$0 sm:$0xff]  ;;  %s4527_s5 = smov 88   ;;  %s4531_s20 = smov 72   ;;  %vm1930_vm7 = vcmask 523264  }
  0x22   :  { %4070 = vmatmul.mubr.msk.f32.vlgmr.msra.gmra.mxu0 %vm122_vm0, %v83_v3  ;;  %4072 = vmatprep.subr.mxu0 %v4641_v4  ;;  %s4532_s2 = smov 104   ;;  %v294_v36 = vsub.s32 0, %v293_v35  ;;  %v84_v37 = vld [vmem:[%s5324_s1] sm:$0x3]  ;;  %v463_v48 = vsub.s32 1, %v293_v35  ;;  %s4533_s1 = smov 56  }
  0x23   :  { %4073 = vmatpush3.msra.mxu0 %v4641_v4  ;;  %s4534_s23 = smov 48   ;;  %s4535_s26 = smov 40  }
  0x24   :  { %4074 = vmatprep.subr.mxu0 %v4649_v5  ;;  %v4736_v38 = vrot.slane %v84_v37, %v294_v36  ;;  %v4783_v50 = vrot.slane %v84_v37, %v463_v48  ;;  %s4536_s4 = smov 16   ;;  %s4537_s29 = smov 24  }
  0x25   :  { %4075 = vmatpush3.msra.mxu0 %v4649_v5 }
  0x26   :  { %4076 = vmatprep.subr.mxu0 %v4656_v6 }
  0x27   :  { %4077 = vmatpush3.msra.mxu0 %v4656_v6 }
  0x28   :  { %4078 = vmatprep.subr.mxu0 %v4663_v7 }
  0x29   :  { %4079 = vmatpush3.msra.mxu0 %v4663_v7 }
  0x2a   :  { %4083 = vmatprep.subr.mxu0 %v4523_v13 }
  0xe2   :  { %v4071_v8 = vpop.f32.mrf.mxu0 }
  0xe3   :  { %v4672_v12 = vadd.f32 %v4071_v8, %v3866_v9 }
  0xe4   :  { %v195_v10 = vpop.f32.mrf.mxu0 }
  0xe5   :  { %v4670_v11 = vadd.f32 %v3866_v9, %v195_v10 }
  0xe7   :  { %4080 = vmatprep.mubr.msk.f32.mxu0 %vm210_vm1, %v4670_v11 }
  0xe8   :  { %4081 = vmatmul.mubr.msk.f32.vlgmr.msra.gmra.mxu0 %vm210_vm1, %v4672_v12 }
  0xe9   :  { %4085 = vmatprep.mubr.msk.f32.mxu0 %vm4524_vm2, %v4523_v13 }
 0x1a8   :  { %v4082_v14 = vpop.f32.mrf.mxu0 }
 0x1a9   :  { %v4697_v18 = vadd.f32 %v4082_v14, %v4687_v15 }
 0x1aa   :  { %v283_v16 = vpop.f32.mrf.mxu0 }
 0x1ab   :  { %v4690_v17 = vadd.f32 %v4687_v15, %v283_v16 }
 0x1ad   :  { %384 = vrot.lane.b32.xlu1 %v4690_v17, %s4525_s30  ;;  %297 = vrot.lane.b32.xlu0 %v4690_v17, %s4526_s0 }
 0x1b1   :  { %466 = vrot.lane.b32.xlu1 %v4697_v18, %s4526_s0 }
 0x1b5   :  { %631 = vrot.lane.b32.xlu1 %v4690_v17, %s4527_s5 }
 0x1b9   :  { %629 = vrot.lane.b32.xlu1 %v4690_v17, %s4528_s17 }
 0x1bd   :  { %796 = vrot.lane.b32.xlu1 %v4697_v18, %s4527_s5 }
 0x1c1   :  { %794 = vrot.lane.b32.xlu1 %v4697_v18, %s4528_s17 }
 0x1c5   :  { %961 = vrot.lane.b32.xlu1 %v4690_v17, %s4529_s18 }
 0x1c9   :  { %959 = vrot.lane.b32.xlu1 %v4690_v17, %s4530_s19 }
 0x1cd   :  { %1126 = vrot.lane.b32.xlu1 %v4697_v18, %s4529_s18 }
 0x1d1   :  { %1291 = vrot.lane.b32.xlu1 %v4690_v17, %s4531_s20 }
 0x1d5   :  { %1289 = vrot.lane.b32.xlu1 %v4690_v17, %s4532_s2 }
 0x1d9   :  { %1456 = vrot.lane.b32.xlu1 %v4697_v18, %s4531_s20 }
 0x1dd   :  { %1454 = vrot.lane.b32.xlu1 %v4697_v18, %s4532_s2 }
 0x1e1   :  { %552 = vrot.lane.b32.xlu1 %v4697_v18, %s4525_s30 }
 0x21f   :  { %v385_v19 = vpop.permute.xlu1 %384  ;;  %v298_v20 = vpop.permute.xlu0 %297 }
 0x220   :  { %4084 = vmatpush3.xpose.msk.msra.mxu0 %vm299_vm3, %v298_v20  ;;  %4089 = vmatpush3.msra.mxu1 %v385_v19 }
 0x221   :  { %4098 = vmatprep.subr.mxu0 %v4523_v13  ;;  %4093 = vmatprep.subr.mxu1 %v4523_v13 }
 0x223   :  { %v467_v21 = vpop.permute.xlu1 %466  ;;  %4086 = vmatmul.mubr.msk.f32.vlgmr.msra.gmra.mxu0 %vm299_vm3, %v4690_v17 }
 0x224   :  { %4100 = vmatprep.mubr.msk.f32.mxu0 %vm4524_vm2, %v4523_v13 }
 0x227   :  { %v632_v22 = vpop.permute.xlu1 %631 }
 0x22b   :  { %v630_v23 = vpop.permute.xlu1 %629 }
 0x22f   :  { %v797_v24 = vpop.permute.xlu1 %796 }
 0x233   :  { %v795_v25 = vpop.permute.xlu1 %794 }
 0x237   :  { %v962_v26 = vpop.permute.xlu1 %961 }
 0x23b   :  { %v960_v27 = vpop.permute.xlu1 %959 }
 0x23f   :  { %v1127_v28 = vpop.permute.xlu1 %1126 }
 0x243   :  { %v1292_v29 = vpop.permute.xlu1 %1291 }
 0x247   :  { %v1290_v30 = vpop.permute.xlu1 %1289 }
 0x24b   :  { %v1457_v31 = vpop.permute.xlu1 %1456 }
 0x24f   :  { %v1455_v32 = vpop.permute.xlu1 %1454 }
 0x253   :  { %v553_v33 = vpop.permute.xlu1 %552 }
 0x254   :  { %4099 = vmatpush3.msra.mxu0 %v553_v33 }
 0x255   :  { %4108 = vmatprep.subr.mxu0 %v4523_v13 }
 0x2e3   :  { %v370_v39 = vpop.f32.mrf.mxu0 }
 0x2e4   :  { %v371_v40 = vadd.f32 %v370_v39, %v4736_v38 }
 0x2e5   :  { %v4087_v41 = vpop.f32.mrf.mxu0 }
 0x2e6   :  { %v374_v42 = vsel %vm299_vm3, %v371_v40, -inf }
 0x2e7   :  { %375 = vmax.xlane.f32.xlu0 %v374_v42 }
 0x2fd   :  { %1124 = vrot.lane.b32.xlu0 %v4697_v18, %s4530_s19 }
 0x370   :  { %v376_v43 = vpop.xlane.xlu0 %375 }
 0x371   :  { %v377_v44 = vsub.f32 %v371_v40, %v376_v43 }
 0x373   :  { %v378_v45 = vmul.f32 1.442695, %v377_v44 }
 0x374   :  { %v1125_v47 = vpop.permute.xlu0 %1124 }
 0x375   :  { %4357 = vpow2.f32 %v378_v45 }
 0x382   :  { %v4742_v46 = vpop.eup %4357 }
 0x383   :  { %4091 = vmatmul.mubr.msk.f32.vlgmr.msra.gmra.mxu1 %vm299_vm3, %v4742_v46 }
 0x384   :  { %4094 = vmatpush3.xpose.msk.msra.mxu1 %vm299_vm3, %v467_v21  ;;  %4095 = vmatprep.mubr.msk.f32.mxu1 %vm4524_vm2, %v4523_v13 }
 0x385   :  { %4103 = vmatprep.subr.mxu1 %v4523_v13 }
 0x387   :  { %4096 = vmatmul.mubr.msk.f32.vlgmr.msra.gmra.mxu1 %vm299_vm3, %v4697_v18 }
 0x388   :  { %4104 = vmatpush3.xpose.msk.msra.mxu1 %vm299_vm3, %v632_v22  ;;  %4105 = vmatprep.mubr.msk.f32.mxu1 %vm4524_vm2, %v4523_v13 }
 0x389   :  { %4113 = vmatprep.subr.mxu1 %v4523_v13 }
 0x38b   :  { %4106 = vmatmul.mubr.msk.f32.vlgmr.msra.gmra.mxu1 %vm299_vm3, %v630_v23 }
 0x38c   :  { %4114 = vmatpush3.xpose.msk.msra.mxu1 %vm299_vm3, %v797_v24  ;;  %4115 = vmatprep.mubr.msk.f32.mxu1 %vm4524_vm2, %v4523_v13 }
 0x38d   :  { %4123 = vmatprep.subr.mxu1 %v4523_v13 }
 0x38f   :  { %4116 = vmatmul.mubr.msk.f32.vlgmr.msra.gmra.mxu1 %vm299_vm3, %v795_v25 }
 0x390   :  { %4124 = vmatpush3.xpose.msk.msra.mxu1 %vm299_vm3, %v962_v26  ;;  %4125 = vmatprep.mubr.msk.f32.mxu1 %vm4524_vm2, %v4523_v13 }
 0x391   :  { %4133 = vmatprep.subr.mxu1 %v4523_v13 }
 0x393   :  { %4126 = vmatmul.mubr.msk.f32.vlgmr.msra.gmra.mxu1 %vm299_vm3, %v960_v27 }
 0x394   :  { %4134 = vmatpush3.xpose.msk.msra.mxu1 %vm299_vm3, %v1127_v28  ;;  %4135 = vmatprep.mubr.msk.f32.mxu1 %vm4524_vm2, %v4523_v13 }
 0x395   :  { %4143 = vmatprep.subr.mxu1 %v4523_v13 }
 0x397   :  { %4136 = vmatmul.mubr.msk.f32.vlgmr.msra.gmra.mxu1 %vm299_vm3, %v1125_v47 }
 0x398   :  { %4144 = vmatpush3.xpose.msk.msra.mxu1 %vm299_vm3, %v1292_v29  ;;  %4145 = vmatprep.mubr.msk.f32.mxu1 %vm4524_vm2, %v4523_v13 }
 0x399   :  { %4153 = vmatprep.subr.mxu1 %v4523_v13 }
 0x39b   :  { %4146 = vmatmul.mubr.msk.f32.vlgmr.msra.gmra.mxu1 %vm299_vm3, %v1290_v30 }
 0x39c   :  { %4154 = vmatpush3.xpose.msk.msra.mxu1 %vm299_vm3, %v1457_v31  ;;  %4155 = vmatprep.mubr.msk.f32.mxu1 %vm4524_vm2, %v4523_v13 }
 0x39f   :  { %4156 = vmatmul.mubr.msk.f32.vlgmr.msra.gmra.mxu1 %vm299_vm3, %v1455_v32 }
 0x443   :  { %v4781_v49 = vpop.f32.mrf.mxu1 }
 0x445   :  { %v4092_v51 = vpop.f32.mrf.mxu1 }
 0x447   :  { %v538_v52 = vpop.f32.mrf.mxu1 }
 0x448   :  { %v539_v53 = vadd.f32 %v538_v52, %v4783_v50 }
 0x449   :  { %v4097_v54 = vpop.f32.mrf.mxu1 }
 0x44a   :  { %v542_v55 = vsel %vm299_vm3, %v539_v53, -inf }
 0x44b   :  { %543 = vmax.xlane.f32.xlu1 %v542_v55  ;;  %v703_v56 = vpop.f32.mrf.mxu1 }
 0x44c   :  { %v704_v57 = vadd.f32 %v703_v56, %v4736_v38 }
 0x44d   :  { %v4107_v58 = vpop.f32.mrf.mxu1 }
 0x44e   :  { %v707_v59 = vsel %vm299_vm3, %v704_v57, -inf }
 0x44f   :  { %708 = vmax.xlane.f32.xlu0 %v707_v59  ;;  %v868_v60 = vpop.f32.mrf.mxu1 }
 0x450   :  { %v869_v61 = vadd.f32 %v868_v60, %v4783_v50 }
 0x451   :  { %v4117_v62 = vpop.f32.mrf.mxu1 }
 0x452   :  { %v872_v63 = vsel %vm299_vm3, %v869_v61, -inf }
 0x453   :  { %873 = vmax.xlane.f32.xlu0 %v872_v63  ;;  %v1033_v0 = vpop.f32.mrf.mxu1 }
 0x454   :  { %v1034_v16 = vadd.f32 %v1033_v0, %v4736_v38 }
 0x455   :  { %v4127_v1 = vpop.f32.mrf.mxu1 }
 0x456   :  { %v1037_v20 = vsel %vm299_vm3, %v1034_v16, -inf }
 0x457   :  { %v1198_v2 = vpop.f32.mrf.mxu1 }
 0x458   :  { %v1199_v19 = vadd.f32 %v1198_v2, %v4783_v50 }
 0x459   :  { %v4137_v3 = vpop.f32.mrf.mxu1 }
 0x45a   :  { %v1202_v22 = vsel %vm299_vm3, %v1199_v19, -inf }
 0x45b   :  { %v1363_v8 = vpop.f32.mrf.mxu1 }
 0x45c   :  { %882 = vrot.lane.b32.xlu1 %v4697_v18, %s4533_s1  ;;  %v4808_v24 = vadd.f32 %v1363_v8, %v4736_v38 }
 0x45d   :  { %v4147_v9 = vpop.f32.mrf.mxu1 }
 0x45e   :  { %v1367_v25 = vsel %vm299_vm3, %v4808_v24, -inf  ;;  %v380_v9 = vsel %vm299_vm3, %v4742_v46, 0.0 }
 0x45f   :  { %v1528_v10 = vpop.f32.mrf.mxu1 }
 0x460   :  { %1047 = vrot.lane.b32.xlu1 %v4690_v17, %s4534_s23  ;;  %v1529_v21 = vadd.f32 %v1528_v10, %v4783_v50 }
 0x461   :  { %v4157_v14 = vpop.f32.mrf.mxu1 }
 0x462   :  { %v1532_v23 = vsel %vm299_vm3, %v1529_v21, -inf }
 0x469   :  { %717 = vrot.lane.b32.xlu0 %v4690_v17, %s4533_s1 }
 0x484   :  { %1038 = vmax.xlane.f32.xlu1 %v1037_v20 }
 0x488   :  { %1203 = vmax.xlane.f32.xlu0 %v1202_v22 }
 0x48c   :  { %1533 = vmax.xlane.f32.xlu0 %v1532_v23 }
 0x495   :  { %1212 = vrot.lane.b32.xlu1 %v4697_v18, %s4534_s23 }
 0x4a2   :  { %1377 = vrot.lane.b32.xlu0 %v4690_v17, %s4535_s26 }
 0x4b9   :  { %1368 = vmax.xlane.f32.xlu1 %v1367_v25 }
 0x4ca   :  { %1542 = vrot.lane.b32.xlu1 %v4697_v18, %s4535_s26 }
 0x4d4   :  { %v544_v26 = vpop.xlane.xlu1 %543 }
 0x4d5   :  { %v545_v27 = vsub.f32 %v539_v53, %v544_v26 }
 0x4d7   :  { %v546_v28 = vmul.f32 1.442695, %v545_v27 }
 0x4d8   :  { %v709_v29 = vpop.xlane.xlu0 %708  ;;  %v883_v18 = vpop.permute.xlu1 %882 }
 0x4d9   :  { %4359 = vpow2.f32 %v546_v28  ;;  %v710_v30 = vsub.f32 %v704_v57, %v709_v29  ;;  %v4855_v29 = vld [vmem:[%s5329_s6 + $0x18] sm:$0xff] }
 0x4da   :  { %4163 = vmatprep.subr.mxu1 %v4855_v29 }
 0x4db   :  { %v711_v31 = vmul.f32 1.442695, %v710_v30  ;;  %v4860_v30 = vld [vmem:[%s5329_s6 + $0x10] sm:$0xff]  ;;  %4164 = vmatpush3.msra.mxu1 %v4855_v29 }
 0x4dc   :  { %v874_v32 = vpop.xlane.xlu0 %873  ;;  %v1048_v40 = vpop.permute.xlu1 %1047  ;;  %4165 = vmatprep.subr.mxu1 %v4860_v30 }
 0x4dd   :  { %4361 = vpow2.f32 %v711_v31  ;;  %v875_v17 = vsub.f32 %v869_v61, %v874_v32  ;;  %4166 = vmatpush3.msra.mxu1 %v4860_v30 }
 0x4df   :  { %v876_v33 = vmul.f32 1.442695, %v875_v17 }
 0x4e0   :  { %v718_v35 = vpop.permute.xlu0 %717 }
 0x4e1   :  { %4363 = vpow2.f32 %v876_v33 }
 0x4e6   :  { %v4360_v34 = vpop.eup %4359 }
 0x4e7   :  { %4101 = vmatmul.mubr.msk.f32.vlgmr.msra.gmra.mxu0 %vm299_vm3, %v4360_v34  ;;  %v548_v62 = vsel %vm299_vm3, %v4360_v34, 0.0 }
 0x4e8   :  { %4109 = vmatpush3.msra.mxu0 %v718_v35  ;;  %4110 = vmatprep.mubr.msk.f32.mxu0 %vm4524_vm2, %v4523_v13 }
 0x4e9   :  { %4118 = vmatprep.subr.mxu0 %v4523_v13 }
 0x4ea   :  { %v4362_v36 = vpop.eup %4361 }
 0x4eb   :  { %4111 = vmatmul.mubr.msk.f32.vlgmr.msra.gmra.mxu0 %vm299_vm3, %v4362_v36  ;;  %v713_v37 = vsel %vm299_vm3, %v4362_v36, 0.0 }
 0x4ec   :  { %4119 = vmatpush3.msra.mxu0 %v883_v18  ;;  %714 = vadd.xlane.f32.xlu0 %v713_v37 }
 0x4ed   :  { %4120 = vmatprep.mubr.msk.f32.mxu0 %vm4524_vm2, %v4523_v13  ;;  %4128 = vmatprep.subr.mxu0 %v4523_v13 }
 0x4ee   :  { %v4364_v39 = vpop.eup %4363 }
 0x4ef   :  { %4121 = vmatmul.mubr.msk.f32.vlgmr.msra.gmra.mxu0 %vm299_vm3, %v4364_v39  ;;  %v878_v41 = vsel %vm299_vm3, %v4364_v39, 0.0 }
 0x4f0   :  { %4129 = vmatpush3.msra.mxu0 %v1048_v40  ;;  %879 = vadd.xlane.f32.xlu1 %v878_v41  ;;  %v4871_v40 = vld [vmem:[%s5329_s6 + $0x8] sm:$0xff]  ;;  %v4877_v41 = vld [vmem:[%s5329_s6] sm:$0xff] }
 0x4f1   :  { %4130 = vmatprep.mubr.msk.f32.mxu0 %vm4524_vm2, %v4523_v13  ;;  %4138 = vmatprep.subr.mxu0 %v4523_v13 }
 0x4f2   :  { %4167 = vmatprep.subr.mxu1 %v4871_v40 }
 0x4f3   :  { %4168 = vmatpush3.msra.mxu1 %v4871_v40 }
 0x4f4   :  { %4169 = vmatprep.subr.mxu1 %v4877_v41 }
 0x4f5   :  { %4170 = vmatpush3.msra.mxu1 %v4877_v41 }
 0x50d   :  { %v1039_v42 = vpop.xlane.xlu1 %1038 }
 0x50e   :  { %v1040_v43 = vsub.f32 %v1034_v16, %v1039_v42 }
 0x510   :  { %v1041_v44 = vmul.f32 1.442695, %v1040_v43 }
 0x511   :  { %v1204_v45 = vpop.xlane.xlu0 %1203  ;;  %v1213_v55 = vpop.permute.xlu1 %1212 }
 0x512   :  { %4365 = vpow2.f32 %v1041_v44  ;;  %v1205_v47 = vsub.f32 %v1199_v19, %v1204_v45 }
 0x514   :  { %v1206_v48 = vmul.f32 1.442695, %v1205_v47 }
 0x515   :  { %v1534_v51 = vpop.xlane.xlu0 %1533 }
 0x516   :  { %4367 = vpow2.f32 %v1206_v48  ;;  %v1535_v52 = vsub.f32 %v1529_v21, %v1534_v51 }
 0x518   :  { %v1536_v53 = vmul.f32 1.442695, %v1535_v52 }
 0x519   :  { %v1378_v58 = vpop.permute.xlu0 %1377 }
 0x51a   :  { %4369 = vpow2.f32 %v1536_v53 }
 0x51f   :  { %v4366_v54 = vpop.eup %4365 }
 0x520   :  { %4131 = vmatmul.mubr.msk.f32.vlgmr.msra.gmra.mxu0 %vm299_vm3, %v4366_v54  ;;  %v1043_v56 = vsel %vm299_vm3, %v4366_v54, 0.0 }
 0x521   :  { %4139 = vmatpush3.msra.mxu0 %v1213_v55  ;;  %1044 = vadd.xlane.f32.xlu0 %v1043_v56 }
 0x522   :  { %4140 = vmatprep.mubr.msk.f32.mxu0 %vm4524_vm2, %v4523_v13  ;;  %4148 = vmatprep.subr.mxu0 %v4523_v13 }
 0x523   :  { %v4368_v57 = vpop.eup %4367 }
 0x524   :  { %4141 = vmatmul.mubr.msk.f32.vlgmr.msra.gmra.mxu0 %vm299_vm3, %v4368_v57  ;;  %v1208_v59 = vsel %vm299_vm3, %v4368_v57, 0.0 }
 0x525   :  { %4149 = vmatpush3.msra.mxu0 %v1378_v58  ;;  %1209 = vadd.xlane.f32.xlu0 %v1208_v59 }
 0x526   :  { %4150 = vmatprep.mubr.msk.f32.mxu0 %vm4524_vm2, %v4523_v13  ;;  %4158 = vmatprep.subr.mxu0 %v4523_v13 }
 0x527   :  { %v4370_v60 = vpop.eup %4369 }
 0x528   :  { %v1538_v61 = vsel %vm299_vm3, %v4370_v60, 0.0 }
 0x529   :  { %1539 = vadd.xlane.f32.xlu1 %v1538_v61 }
 0x52d   :  { %549 = vadd.xlane.f32.xlu1 %v548_v62 }
 0x542   :  { %v1369_v63 = vpop.xlane.xlu1 %1368 }
 0x543   :  { %v1370_v0 = vsub.f32 %v4808_v24, %v1369_v63 }
 0x545   :  { %v1371_v1 = vmul.f32 1.442695, %v1370_v0 }
 0x546   :  { %v1543_v3 = vpop.permute.xlu1 %1542 }
 0x547   :  { %4371 = vpow2.f32 %v1371_v1 }
 0x554   :  { %v4372_v2 = vpop.eup %4371 }
 0x555   :  { %4151 = vmatmul.mubr.msk.f32.vlgmr.msra.gmra.mxu0 %vm299_vm3, %v4372_v2  ;;  %v1373_v8 = vsel %vm299_vm3, %v4372_v2, 0.0 }
 0x556   :  { %4159 = vmatpush3.msra.mxu0 %v1543_v3  ;;  %1374 = vadd.xlane.f32.xlu0 %v1373_v8 }
 0x557   :  { %4160 = vmatprep.mubr.msk.f32.mxu0 %vm4524_vm2, %v4523_v13 }
 0x559   :  { %4161 = vmatmul.mubr.msk.f32.vlgmr.msra.gmra.mxu0 %vm299_vm3, %v4370_v60 }
 0x55a   :  { %381 = vadd.xlane.f32.xlu0 %v380_v9 }
 0x575   :  { %v715_v10 = vpop.xlane.xlu0 %714 }
 0x576   :  { %4373 = vrcp.f32 %v715_v10  ;;  %v4897_v10 = vld [vmem:[%s5330_s7] ss:$0 sm:$0xff] }
 0x579   :  { %v880_v14 = vpop.xlane.xlu1 %879 }
 0x57a   :  { %4375 = vrcp.f32 %v880_v14 }
 0x583   :  { %v4374_v20 = vpop.eup %4373 }
 0x587   :  { %v4376_v24 = vpop.eup %4375 }
 0x5a7   :  { %v4848_v16 = vpop.f32.mrf.mxu0 }
 0x5a9   :  { %v4102_v19 = vpop.f32.mrf.mxu0 }
 0x5aa   :  { %v1045_v46 = vpop.xlane.xlu0 %1044 }
 0x5ab   :  { %v789_v21 = vpop.f32.mrf.mxu0  ;;  %4377 = vrcp.f32 %v1045_v46 }
 0x5ac   :  { %v793_v22 = vmul.f32 %v4374_v20, %v789_v21 }
 0x5ad   :  { %v4112_v23 = vpop.f32.mrf.mxu0 }
 0x5ae   :  { %1620 = vrot.lane.b32.xlu0 %v793_v22, %s4521_s25  ;;  %v1210_v28 = vpop.xlane.xlu0 %1209 }
 0x5af   :  { %v954_v25 = vpop.f32.mrf.mxu0  ;;  %4379 = vrcp.f32 %v1210_v28 }
 0x5b0   :  { %v958_v26 = vmul.f32 %v4376_v24, %v954_v25 }
 0x5b1   :  { %v4122_v27 = vpop.f32.mrf.mxu0 }
 0x5b2   :  { %1636 = vrot.lane.b32.xlu1 %v958_v26, %s4521_s25  ;;  %v1540_v39 = vpop.xlane.xlu1 %1539 }
 0x5b6   :  { %v550_v54 = vpop.xlane.xlu1 %549 }
 0x5b8   :  { %v4378_v31 = vpop.eup %4377 }
 0x5bc   :  { %v4380_v34 = vpop.eup %4379 }
 0x5df   :  { %v1375_v37 = vpop.xlane.xlu0 %1374 }
 0x5e0   :  { %v1119_v32 = vpop.f32.mrf.mxu0  ;;  %4381 = vrcp.f32 %v1375_v37 }
 0x5e1   :  { %v1123_v17 = vmul.f32 %v4378_v31, %v1119_v32  ;;  %4383 = vrcp.f32 %v1540_v39 }
 0x5e2   :  { %v4132_v33 = vpop.f32.mrf.mxu0 }
 0x5e3   :  { %1624 = vrot.lane.b32.xlu1 %v1123_v17, %s4536_s4  ;;  %v382_v53 = vpop.xlane.xlu0 %381 }
 0x5e4   :  { %v1284_v35 = vpop.f32.mrf.mxu0  ;;  %4385 = vrcp.f32 %v382_v53 }
 0x5e5   :  { %v1288_v18 = vmul.f32 %v4380_v34, %v1284_v35  ;;  %4387 = vrcp.f32 %v550_v54  ;;  %v4917_v34 = vld [vmem:[%s5333_s10 + $0x10] sm:$0xff]  ;;  %v4922_v35 = vld [vmem:[%s5333_s10 + $0x8] sm:$0xff] }
 0x5e6   :  { %v4142_v36 = vpop.f32.mrf.mxu0 }
 0x5e7   :  { %1640 = vrot.lane.b32.xlu0 %v1288_v18, %s4536_s4  ;;  %v4929_v18 = vld [vmem:[%s5333_s10] sm:$0xff] }
 0x5ed   :  { %v4382_v42 = vpop.eup %4381 }
 0x5ee   :  { %v4384_v47 = vpop.eup %4383 }
 0x5f1   :  { %v4386_v56 = vpop.eup %4385 }
 0x5f2   :  { %v460_v59 = vmul.f32 %v4386_v56, %v4781_v49  ;;  %v4388_v60 = vpop.eup %4387 }
 0x5f3   :  { %v628_v0 = vmul.f32 %v4388_v60, %v4848_v16  ;;  %v5011_v60 = vld [vmem:[%s5335_s12 + $0x8] sm:$0xff] }
 0x615   :  { %v1449_v43 = vpop.f32.mrf.mxu0 }
 0x616   :  { %v1453_v44 = vmul.f32 %v4382_v42, %v1449_v43 }
 0x617   :  { %v4152_v45 = vpop.f32.mrf.mxu0 }
 0x618   :  { %1628 = vrot.lane.b32.xlu1 %v1453_v44, %s4537_s29 }
 0x619   :  { %v1614_v48 = vpop.f32.mrf.mxu0 }
 0x61a   :  { %v1618_v51 = vmul.f32 %v4384_v47, %v1614_v48  ;;  %v4939_v47 = vld [vmem:[%s5331_s8] ss:$0 sm:$0xff] }
 0x61b   :  { %v4162_v52 = vpop.f32.mrf.mxu0 }
 0x61c   :  { %1644 = vrot.lane.b32.xlu1 %v1618_v51, %s4537_s29  ;;  %v4944_v51 = vld [vmem:[%s5332_s9] ss:$0 sm:$0xff] }
 0x620   :  { %v1621_v57 = vpop.permute.xlu0 %1620 }
 0x621   :  { %v1631_v61 = vsel %vm299_vm3, %v460_v59, %v1621_v57  ;;  %v5004_v59 = vld [vmem:[%s5335_s12 + $0x10] sm:$0xff] }
 0x624   :  { %v1637_v55 = vpop.permute.xlu1 %1636 }
 0x625   :  { %v1647_v3 = vsel %vm299_vm3, %v628_v0, %v1637_v55 }
 0x655   :  { %v1625_v58 = vpop.permute.xlu1 %1624 }
 0x656   :  { %v1632_v62 = vsel %vm122_vm0, %v1631_v61, %v1625_v58  ;;  %v4969_v58 = vld [vmem:[%s5335_s12 + $0x38] sm:$0xff]  ;;  %v5018_v61 = vld [vmem:[%s5335_s12] sm:$0xff] }
 0x657   :  { %4185 = vmatprep.subr.mxu1 %v4969_v58 }
 0x659   :  { %v1641_v1 = vpop.permute.xlu0 %1640 }
 0x65a   :  { %v1648_v8 = vsel %vm122_vm0, %v1647_v3, %v1641_v1 }
 0x68a   :  { %v1629_v63 = vpop.permute.xlu1 %1628 }
 0x68b   :  { %v1634_v2 = vsel %vm1633_vm4, %v1632_v62, %v1629_v63  ;;  %v5026_v62 = vld [vmem:[%s5334_s11] ss:$0 sm:$0xff] }
 0x68c   :  { %4171 = vmatprep.mubr.msk.f32.mxu1 %vm210_vm1, %v1634_v2 }
 0x68e   :  { %v1645_v9 = vpop.permute.xlu1 %1644 }
 0x68f   :  { %v1649_v49 = vsel %vm1633_vm4, %v1648_v8, %v1645_v9 }
 0x690   :  { %4172 = vmatmul.mubr.msk.f32.vlgmr.msra.gmra.mxu1 %vm210_vm1, %v1649_v49 }
 0x691   :  { %4186 = vmatpush3.msra.mxu1 %v4969_v58 }
 0x750   :  { %v4173_v14 = vpop.f32.mrf.mxu1 }
 0x751   :  { %v1734_v16 = vadd.f32 %v4173_v14, %v4897_v10 }
 0x752   :  { %v1728_v19 = vpop.f32.mrf.mxu1 }
 0x753   :  { %v1729_v20 = vadd.f32 %v4897_v10, %v1728_v19  ;;  %v1738_v21 = vadd.f32 %v1734_v16, %v4672_v12 }
 0x755   :  { %v1742_v22 = vsel %vm210_vm1, %v1738_v21, 0.0  ;;  %v1737_v23 = vadd.f32 %v1729_v20, %v4670_v11  ;;  %v4910_v11 = vld [vmem:[%s5333_s10 + $0x18] sm:$0xff] }
 0x756   :  { %1743 = vadd.xlane.f32.xlu1 %v1742_v22  ;;  %4174 = vmatprep.subr.mxu0 %v4910_v11 }
 0x757   :  { %v1739_v24 = vsel %vm210_vm1, %v1737_v23, 0.0  ;;  %4175 = vmatpush3.msra.mxu0 %v4910_v11 }
 0x758   :  { %1740 = vadd.xlane.f32.xlu0 %v1739_v24  ;;  %4176 = vmatprep.subr.mxu0 %v4917_v34 }
 0x759   :  { %4177 = vmatpush3.msra.mxu0 %v4917_v34 }
 0x75a   :  { %4178 = vmatprep.subr.mxu0 %v4922_v35 }
 0x75b   :  { %4179 = vmatpush3.msra.mxu0 %v4922_v35 }
 0x75c   :  { %4180 = vmatprep.subr.mxu0 %v4929_v18 }
 0x75d   :  { %4181 = vmatpush3.msra.mxu0 %v4929_v18 }
 0x75e   :  { %4204 = vmatprep.subr.mxu0 %v4641_v4 }
 0x7df   :  { %v1744_v25 = vpop.xlane.xlu1 %1743 }
 0x7e0   :  { %v1747_v26 = vmul.f32 0.03125, %v1744_v25 }
 0x7e1   :  { %v1741_v27 = vpop.xlane.xlu0 %1740 }
 0x7e2   :  { %v1746_v46 = vmul.f32 0.03125, %v1741_v27  ;;  %v1749_v28 = vsub.f32 %v1738_v21, %v1747_v26 }
 0x7e4   :  { %v1748_v31 = vsub.f32 %v1737_v23, %v1746_v46  ;;  %v1751_v33 = vmul.f32 %v1749_v28, %v1749_v28 }
 0x7e6   :  { %v1750_v32 = vmul.f32 %v1748_v31, %v1748_v31  ;;  %v1755_v12 = vsel %vm210_vm1, %v1751_v33, 0.0 }
 0x7e8   :  { %v1752_v17 = vsel %vm210_vm1, %v1750_v32, 0.0 }
 0x7e9   :  { %1753 = vadd.xlane.f32.xlu0 %v1752_v17 }
 0x7ed   :  { %1756 = vadd.xlane.f32.xlu0 %v1755_v12 }
 0x872   :  { %v1754_v36 = vpop.xlane.xlu0 %1753 }
 0x873   :  { %v1758_v37 = vmul.f32 0.03125, %v1754_v36 }
 0x875   :  { %v1760_v39 = vadd.f32 1e-12, %v1758_v37 }
 0x876   :  { %v1757_v42 = vpop.xlane.xlu0 %1756 }
 0x877   :  { %4389 = vrsqrt.f32 %v1760_v39  ;;  %v1759_v43 = vmul.f32 0.03125, %v1757_v42 }
 0x879   :  { %v1761_v44 = vadd.f32 1e-12, %v1759_v43 }
 0x87b   :  { %4391 = vrsqrt.f32 %v1761_v44 }
 0x884   :  { %v4390_v45 = vpop.eup %4389 }
 0x885   :  { %v1764_v48 = vmul.f32 %v4390_v45, %v1748_v31 }
 0x887   :  { %v1772_v52 = vmul.f32 %v4939_v47, %v1764_v48 }
 0x888   :  { %v4392_v53 = vpop.eup %4391 }
 0x889   :  { %v1765_v54 = vmul.f32 %v4392_v53, %v1749_v28  ;;  %v4948_v55 = vadd.f32 %v4944_v51, %v1772_v52 }
 0x88b   :  { %4182 = vmatprep.mubr.msk.f32.mxu0 %vm210_vm1, %v4948_v55  ;;  %v1773_v56 = vmul.f32 %v4939_v47, %v1765_v54 }
 0x88d   :  { %v4954_v57 = vadd.f32 %v4944_v51, %v1773_v56 }
 0x88f   :  { %4183 = vmatmul.mubr.msk.f32.vlgmr.msra.gmra.mxu0 %vm210_vm1, %v4954_v57 }
 0x890   :  { %4205 = vmatpush3.msra.mxu0 %v4641_v4  ;;  %v4976_v4 = vld [vmem:[%s5335_s12 + $0x30] sm:$0xff] }
 0x891   :  { %4206 = vmatprep.subr.mxu0 %v4649_v5  ;;  %4187 = vmatprep.subr.mxu1 %v4976_v4 }
 0x892   :  { %4207 = vmatpush3.msra.mxu0 %v4649_v5  ;;  %4188 = vmatpush3.msra.mxu1 %v4976_v4  ;;  %v4983_v5 = vld [vmem:[%s5335_s12 + $0x28] sm:$0xff] }
 0x893   :  { %4208 = vmatprep.subr.mxu0 %v4656_v6  ;;  %4189 = vmatprep.subr.mxu1 %v4983_v5 }
 0x894   :  { %4209 = vmatpush3.msra.mxu0 %v4656_v6  ;;  %4190 = vmatpush3.msra.mxu1 %v4983_v5  ;;  %v4990_v6 = vld [vmem:[%s5335_s12 + $0x20] sm:$0xff] }
 0x895   :  { %4210 = vmatprep.subr.mxu0 %v4663_v7  ;;  %4191 = vmatprep.subr.mxu1 %v4990_v6 }
 0x896   :  { %4211 = vmatpush3.msra.mxu0 %v4663_v7  ;;  %4192 = vmatpush3.msra.mxu1 %v4990_v6  ;;  %v4997_v7 = vld [vmem:[%s5335_s12 + $0x18] sm:$0xff] }
 0x897   :  { %4215 = vmatprep.subr.mxu0 %v4523_v13  ;;  %4193 = vmatprep.subr.mxu1 %v4997_v7 }
 0x898   :  { %4194 = vmatpush3.msra.mxu1 %v4997_v7 }
 0x899   :  { %4195 = vmatprep.subr.mxu1 %v5004_v59 }
 0x89a   :  { %4196 = vmatpush3.msra.mxu1 %v5004_v59 }
 0x89b   :  { %4197 = vmatprep.subr.mxu1 %v5011_v60 }
 0x89c   :  { %4198 = vmatpush3.msra.mxu1 %v5011_v60 }
 0x89d   :  { %4199 = vmatprep.subr.mxu1 %v5018_v61 }
 0x89e   :  { %4200 = vmatpush3.msra.mxu1 %v5018_v61 }
 0x89f   :  { %4225 = vmatprep.subr.mxu1 %v4523_v13 }
 0x94f   :  { %v4184_v63 = vpop.f32.mrf.mxu0 }
 0x950   :  { %v1866_v0 = vadd.f32 %v4184_v63, %v5026_v62 }
 0x951   :  { %v1860_v1 = vpop.f32.mrf.mxu0 }
 0x952   :  { %v1873_v2 = vmul.f32 0.70710677, %v1866_v0  ;;  %v1861_v3 = vadd.f32 %v5026_v62, %v1860_v1 }
 0x954   :  { %v1879_v8 = vand.u32 2147483647, %v1873_v2  ;;  %v1872_v9 = vmul.f32 0.70710677, %v1861_v3  ;;  %vm1875_vm5 = vcmp.ge.f32.partialorder %v1873_v2, 0.0 }
 0x956   :  { %v1881_v49 = vmul.f32 0.3275911, %v1879_v8  ;;  %v1878_v14 = vand.u32 2147483647, %v1872_v9  ;;  %v1907_v21 = vsub.f32 0.0, %v1879_v8  ;;  %vm1874_vm6 = vcmp.ge.f32.partialorder %v1872_v9, 0.0 }
 0x957   :  { %v5039_v9 = vld [vmem:[%s5336_s13] ss:$0 sm:$0xff] }
 0x958   :  { %v1883_v16 = vadd.f32 1.0, %v1881_v49  ;;  %v1880_v19 = vmul.f32 0.3275911, %v1878_v14  ;;  %v1906_v22 = vsub.f32 0.0, %v1878_v14  ;;  %v1909_v23 = vmul.f32 %v1907_v21, %v1879_v8 }
 0x95a   :  { %4393 = vrcp.f32 %v1883_v16  ;;  %v1882_v20 = vadd.f32 1.0, %v1880_v19  ;;  %v1908_v25 = vmul.f32 %v1906_v22, %v1878_v14  ;;  %v1912_v27 = vmul.f32 1.442695, %v1909_v23 }
 0x95b   :  { %v4538_v14 = vmov -1.0  }
 0x95c   :  { %4395 = vrcp.f32 %v1882_v20  ;;  %v1910_v32 = vmul.f32 1.442695, %v1908_v25  ;;  %v1877_v16 = vsel %vm1875_vm5, 1.0, %v4538_v14  ;;  %v1876_v22 = vsel %vm1874_vm6, 1.0, %v4538_v14 }
 0x95d   :  { %4397 = vpow2.f32 %v1912_v27  ;;  %v1870_v27 = vmul.f32 0.5, %v1866_v0 }
 0x95e   :  { %4399 = vpow2.f32 %v1910_v32 }
 0x967   :  { %v4394_v24 = vpop.eup %4393 }
 0x968   :  { %v1889_v26 = vmul.f32 1.0614054, %v4394_v24 }
 0x969   :  { %v4396_v46 = vpop.eup %4395 }
 0x96a   :  { %v1891_v28 = vadd.f32 -1.4531521, %v1889_v26  ;;  %v1888_v31 = vmul.f32 1.0614054, %v4396_v46  ;;  %v4398_v54 = vpop.eup %4397  ;;  %v1869_v26 = vmul.f32 0.5, %v1861_v3 }
 0x96b   :  { %v4400_v8 = vpop.eup %4399 }
 0x96c   :  { %v1893_v17 = vmul.f32 %v4394_v24, %v1891_v28  ;;  %v1890_v33 = vadd.f32 -1.4531521, %v1888_v31 }
 0x96e   :  { %v1895_v12 = vadd.f32 1.4214138, %v1893_v17  ;;  %v1892_v36 = vmul.f32 %v4396_v46, %v1890_v33 }
 0x970   :  { %v1897_v37 = vmul.f32 %v4394_v24, %v1895_v12  ;;  %v1894_v39 = vadd.f32 1.4214138, %v1892_v36 }
 0x972   :  { %v1899_v42 = vadd.f32 -0.28449672, %v1897_v37  ;;  %v1896_v43 = vmul.f32 %v4396_v46, %v1894_v39 }
 0x974   :  { %v1901_v44 = vmul.f32 %v4394_v24, %v1899_v42  ;;  %v1898_v45 = vadd.f32 -0.28449672, %v1896_v43 }
 0x976   :  { %v1903_v48 = vadd.f32 0.2548296, %v1901_v44  ;;  %v1900_v52 = vmul.f32 %v4396_v46, %v1898_v45 }
 0x978   :  { %v1905_v53 = vmul.f32 %v4394_v24, %v1903_v48  ;;  %v1902_v56 = vadd.f32 0.2548296, %v1900_v52 }
 0x97a   :  { %v1915_v63 = vmul.f32 %v4398_v54, %v1905_v53  ;;  %v1904_v1 = vmul.f32 %v4396_v46, %v1902_v56 }
 0x97c   :  { %v1917_v49 = vsub.f32 1.0, %v1915_v63  ;;  %v1914_v19 = vmul.f32 %v4400_v8, %v1904_v1 }
 0x97e   :  { %v1919_v20 = vmul.f32 %v1917_v49, %v1877_v16  ;;  %v1916_v21 = vsub.f32 1.0, %v1914_v19  ;;  %v5052_v16 = vld [vmem:[%s5337_s14] ss:$0 sm:$0xff]  ;;  %s4539_s14 = smov [#allocation7]  }
 0x980   :  { %v1918_v23 = vmul.f32 %v1916_v21, %v1876_v22  ;;  %v1921_v25 = vadd.f32 1.0, %v1919_v20  ;;  %v5058_v22 = vld [vmem:[%s5338_s15] ss:$0 sm:$0xff]  ;;  %s3853_s15 = sshll.u32 %s4539_s14, 4  ;;  %s3854_s15 = int_to_ptr.vmem [resolvable:$true] %s3853_s15 }
 0x981   :  { %p4498_p11 = scmp.lt.s32.totalorder %s3854_s15, %s3854_s15 }
 0x982   :  { %v1920_v24 = vadd.f32 1.0, %v1918_v23  ;;  %v1923_v28 = vmul.f32 %v1921_v25, %v1870_v27 }
 0x984   :  { %v1922_v2 = vmul.f32 %v1920_v24, %v1869_v26 }
 0x986   :  { %4201 = vmatprep.mubr.msk.f32.mxu1 %vm1930_vm7, %v1922_v2 }
 0x987   :  { %4202 = vmatmul.mubr.msk.f32.vlgmr.msra.gmra.mxu1 %vm1930_vm7, %v1923_v28 }
 0x988   :  { %4227 = vmatprep.mubr.msk.f32.mxu1 %vm4524_vm2, %v4523_v13 }
 0xa47   :  { %v4203_v46 = vpop.f32.mrf.mxu1 }
 0xa48   :  { %v2009_v3 = vadd.f32 %v4203_v46, %v5039_v9 }
 0xa49   :  { %v2003_v31 = vpop.f32.mrf.mxu1 }
 0xa4a   :  { %v2004_v0 = vadd.f32 %v5039_v9, %v2003_v31  ;;  %v2013_v32 = vadd.f32 %v2009_v3, %v4954_v57 }
 0xa4c   :  { %v2017_v17 = vsel %vm210_vm1, %v2013_v32, 0.0  ;;  %v2012_v33 = vadd.f32 %v2004_v0, %v4948_v55 }
 0xa4d   :  { %2018 = vadd.xlane.f32.xlu1 %v2017_v17 }
 0xa4e   :  { %v2014_v12 = vsel %vm210_vm1, %v2012_v33, 0.0 }
 0xa4f   :  { %2015 = vadd.xlane.f32.xlu0 %v2014_v12 }
 0xad6   :  { %v2019_v36 = vpop.xlane.xlu1 %2018 }
 0xad7   :  { %v2021_v37 = vmul.f32 0.03125, %v2019_v36 }
 0xad8   :  { %v2016_v39 = vpop.xlane.xlu0 %2015 }
 0xad9   :  { %v2023_v42 = vsub.f32 %v2013_v32, %v2021_v37  ;;  %v2020_v43 = vmul.f32 0.03125, %v2016_v39 }
 0xadb   :  { %v2022_v44 = vsub.f32 %v2012_v33, %v2020_v43  ;;  %v2025_v45 = vmul.f32 %v2023_v42, %v2023_v42 }
 0xadd   :  { %v2029_v48 = vsel %vm210_vm1, %v2025_v45, 0.0  ;;  %v2024_v52 = vmul.f32 %v2022_v44, %v2022_v44 }
 0xade   :  { %2030 = vadd.xlane.f32.xlu1 %v2029_v48 }
 0xadf   :  { %v2026_v57 = vsel %vm210_vm1, %v2024_v52, 0.0 }
 0xae0   :  { %2027 = vadd.xlane.f32.xlu0 %v2026_v57 }
 0xb67   :  { %v2031_v53 = vpop.xlane.xlu1 %2030 }
 0xb68   :  { %v2033_v55 = vmul.f32 0.03125, %v2031_v53 }
 0xb69   :  { %v2028_v54 = vpop.xlane.xlu0 %2027 }
 0xb6a   :  { %v2035_v56 = vadd.f32 1e-12, %v2033_v55  ;;  %v2032_v63 = vmul.f32 0.03125, %v2028_v54 }
 0xb6c   :  { %4401 = vrsqrt.f32 %v2035_v56  ;;  %v2034_v1 = vadd.f32 1e-12, %v2032_v63 }
 0xb6e   :  { %4403 = vrsqrt.f32 %v2034_v1 }
 0xb79   :  { %v4402_v8 = vpop.eup %4401 }
 0xb7a   :  { %v2039_v49 = vmul.f32 %v4402_v8, %v2023_v42 }
 0xb7b   :  { %v4404_v19 = vpop.eup %4403 }
 0xb7c   :  { %v2038_v20 = vmul.f32 %v4404_v19, %v2022_v44  ;;  %v2047_v21 = vmul.f32 %v5052_v16, %v2039_v49 }
 0xb7e   :  { %v2046_v23 = vmul.f32 %v5052_v16, %v2038_v20  ;;  %v5065_v26 = vadd.f32 %v5058_v22, %v2047_v21 }
 0xb80   :  { %v5062_v25 = vadd.f32 %v5058_v22, %v2046_v23 }
 0xb82   :  { %4212 = vmatprep.mubr.msk.f32.mxu0 %vm210_vm1, %v5062_v25 }
 0xb83   :  { %4213 = vmatmul.mubr.msk.f32.vlgmr.msra.gmra.mxu0 %vm210_vm1, %v5065_v26 }
 0xb84   :  { %4217 = vmatprep.mubr.msk.f32.mxu0 %vm4524_vm2, %v4523_v13 }
 0xc43   :  { %v4214_v24 = vpop.f32.mrf.mxu0 }
 0xc44   :  { %v5074_v27 = vadd.f32 %v4214_v24, %v4687_v15 }
 0xc45   :  { %v2128_v2 = vpop.f32.mrf.mxu0 }
 0xc46   :  { %v5077_v28 = vadd.f32 %v4687_v15, %v2128_v2  ;;  %2302 = vrot.lane.b32.xlu1 %v5074_v27, %s4526_s0 }
 0xc48   :  { %2138 = vrot.lane.b32.xlu0 %v5077_v28, %s4526_s0 }
 0xc4a   :  { %2467 = vrot.lane.b32.xlu1 %v5077_v28, %s4527_s5 }
 0xc4c   :  { %2632 = vrot.lane.b32.xlu0 %v5074_v27, %s4527_s5 }
 0xc4e   :  { %2465 = vrot.lane.b32.xlu1 %v5077_v28, %s4528_s17 }
 0xc50   :  { %2797 = vrot.lane.b32.xlu0 %v5077_v28, %s4529_s18 }
 0xc52   :  { %2630 = vrot.lane.b32.xlu1 %v5074_v27, %s4528_s17 }
 0xc54   :  { %2962 = vrot.lane.b32.xlu0 %v5074_v27, %s4529_s18 }
 0xc56   :  { %2795 = vrot.lane.b32.xlu1 %v5077_v28, %s4530_s19 }
 0xc58   :  { %3127 = vrot.lane.b32.xlu0 %v5077_v28, %s4531_s20 }
 0xc5a   :  { %2960 = vrot.lane.b32.xlu1 %v5074_v27, %s4530_s19 }
 0xc5c   :  { %3292 = vrot.lane.b32.xlu0 %v5074_v27, %s4531_s20 }
 0xc5e   :  { %3125 = vrot.lane.b32.xlu1 %v5077_v28, %s4532_s2 }
 0xc60   :  { %2224 = vrot.lane.b32.xlu0 %v5077_v28, %s4525_s30 }
 0xc62   :  { %3290 = vrot.lane.b32.xlu1 %v5074_v27, %s4532_s2 }
 0xc66   :  { %2388 = vrot.lane.b32.xlu1 %v5074_v27, %s4525_s30  ;;  %s4493_s30 = scalar_lea.vmem %s3854_s15, 256 }
 0xc67   :  { %p4494_p10 = scmp.ne.s32.totalorder %s3854_s15, %s4493_s30  ;;  %p4499_p12 = scmp.lt.s32.totalorder %s4493_s30, %s4493_s30 }
 0xc69   :  { %p4500_p13 = por %p4499_p12, %p4498_p11 }
 0xc6a   :  { %2718 = vrot.lane.b32.xlu1 %v5074_v27, %s4533_s1 }
 0xc6b   :  { %p4501_p0 = pnand %p4500_p13, %p4494_p10 }
 0xc6e   :  { %2553 = vrot.lane.b32.xlu1 %v5077_v28, %s4533_s1 }
 0xcb8   :  { %v2303_v15 = vpop.permute.xlu1 %2302 }
 0xcb9   :  { %4226 = vmatpush3.xpose.msk.msra.mxu1 %vm299_vm3, %v2303_v15 }
 0xcba   :  { %v2139_v46 = vpop.permute.xlu0 %2138  ;;  %4235 = vmatprep.subr.mxu1 %v4523_v13 }
 0xcbb   :  { %4216 = vmatpush3.xpose.msk.msra.mxu0 %vm299_vm3, %v2139_v46 }
 0xcbc   :  { %4228 = vmatmul.mubr.msk.f32.vlgmr.msra.gmra.mxu1 %vm299_vm3, %v5074_v27  ;;  %v2468_v3 = vpop.permute.xlu1 %2467  ;;  %4220 = vmatprep.subr.mxu0 %v4523_v13 }
 0xcbd   :  { %4236 = vmatpush3.xpose.msk.msra.mxu1 %vm299_vm3, %v2468_v3  ;;  %4237 = vmatprep.mubr.msk.f32.mxu1 %vm4524_vm2, %v4523_v13 }
 0xcbe   :  { %4218 = vmatmul.mubr.msk.f32.vlgmr.msra.gmra.mxu0 %vm299_vm3, %v5077_v28  ;;  %v2633_v31 = vpop.permute.xlu0 %2632  ;;  %4245 = vmatprep.subr.mxu1 %v4523_v13 }
 0xcbf   :  { %4222 = vmatprep.mubr.msk.f32.mxu0 %vm4524_vm2, %v4523_v13 }
 0xcc0   :  { %v2466_v0 = vpop.permute.xlu1 %2465 }
 0xcc1   :  { %4238 = vmatmul.mubr.msk.f32.vlgmr.msra.gmra.mxu1 %vm299_vm3, %v2466_v0 }
 0xcc2   :  { %4246 = vmatpush3.xpose.msk.msra.mxu1 %vm299_vm3, %v2633_v31  ;;  %v2798_v32 = vpop.permute.xlu0 %2797  ;;  %4247 = vmatprep.mubr.msk.f32.mxu1 %vm4524_vm2, %v4523_v13 }
 0xcc3   :  { %4255 = vmatprep.subr.mxu1 %v4523_v13 }
 0xcc4   :  { %v2631_v17 = vpop.permute.xlu1 %2630 }
 0xcc5   :  { %4248 = vmatmul.mubr.msk.f32.vlgmr.msra.gmra.mxu1 %vm299_vm3, %v2631_v17 }
 0xcc6   :  { %4256 = vmatpush3.xpose.msk.msra.mxu1 %vm299_vm3, %v2798_v32  ;;  %v2963_v33 = vpop.permute.xlu0 %2962  ;;  %4257 = vmatprep.mubr.msk.f32.mxu1 %vm4524_vm2, %v4523_v13 }
 0xcc7   :  { %4265 = vmatprep.subr.mxu1 %v4523_v13 }
 0xcc8   :  { %v2796_v12 = vpop.permute.xlu1 %2795 }
 0xcc9   :  { %4258 = vmatmul.mubr.msk.f32.vlgmr.msra.gmra.mxu1 %vm299_vm3, %v2796_v12 }
 0xcca   :  { %4266 = vmatpush3.xpose.msk.msra.mxu1 %vm299_vm3, %v2963_v33  ;;  %v3128_v36 = vpop.permute.xlu0 %3127  ;;  %4267 = vmatprep.mubr.msk.f32.mxu1 %vm4524_vm2, %v4523_v13 }
 0xccb   :  { %4275 = vmatprep.subr.mxu1 %v4523_v13 }
 0xccc   :  { %v2961_v37 = vpop.permute.xlu1 %2960 }
 0xccd   :  { %4268 = vmatmul.mubr.msk.f32.vlgmr.msra.gmra.mxu1 %vm299_vm3, %v2961_v37 }
 0xcce   :  { %4276 = vmatpush3.xpose.msk.msra.mxu1 %vm299_vm3, %v3128_v36  ;;  %v3293_v39 = vpop.permute.xlu0 %3292  ;;  %4277 = vmatprep.mubr.msk.f32.mxu1 %vm4524_vm2, %v4523_v13 }
 0xccf   :  { %4285 = vmatprep.subr.mxu1 %v4523_v13 }
 0xcd0   :  { %v3126_v42 = vpop.permute.xlu1 %3125 }
 0xcd1   :  { %4278 = vmatmul.mubr.msk.f32.vlgmr.msra.gmra.mxu1 %vm299_vm3, %v3126_v42 }
 0xcd2   :  { %4286 = vmatpush3.xpose.msk.msra.mxu1 %vm299_vm3, %v3293_v39  ;;  %v2225_v43 = vpop.permute.xlu0 %2224  ;;  %4287 = vmatprep.mubr.msk.f32.mxu1 %vm4524_vm2, %v4523_v13 }
 0xcd3   :  { %4221 = vmatpush3.msra.mxu0 %v2225_v43  ;;  %4295 = vmatprep.subr.mxu1 %v4855_v29 }
 0xcd4   :  { %v3291_v44 = vpop.permute.xlu1 %3290  ;;  %4230 = vmatprep.subr.mxu0 %v4523_v13 }
 0xcd5   :  { %4288 = vmatmul.mubr.msk.f32.vlgmr.msra.gmra.mxu1 %vm299_vm3, %v3291_v44 }
 0xcd6   :  { %4296 = vmatpush3.msra.mxu1 %v4855_v29 }
 0xcd7   :  { %4297 = vmatprep.subr.mxu1 %v4860_v30 }
 0xcd8   :  { %4298 = vmatpush3.msra.mxu1 %v4860_v30 }
 0xcd9   :  { %4299 = vmatprep.subr.mxu1 %v4871_v40 }
 0xcda   :  { %4300 = vmatpush3.msra.mxu1 %v4871_v40 }
 0xcdb   :  { %4301 = vmatprep.subr.mxu1 %v4877_v41 }
 0xcdc   :  { %4302 = vmatpush3.msra.mxu1 %v4877_v41 }
 0xcdd   :  { %4317 = vmatprep.subr.mxu1 %v4969_v58 }
 0xd7c   :  { %v2374_v45 = vpop.f32.mrf.mxu1 }
 0xd7d   :  { %v2375_v48 = vadd.f32 %v2374_v45, %v4783_v50 }
 0xd7e   :  { %v2210_v52 = vpop.f32.mrf.mxu0  ;;  %v4229_v57 = vpop.f32.mrf.mxu1 }
 0xd7f   :  { %v2211_v29 = vadd.f32 %v2210_v52, %v4736_v38  ;;  %v2378_v53 = vsel %vm299_vm3, %v2375_v48, -inf }
 0xd80   :  { %2379 = vmax.xlane.f32.xlu1 %v2378_v53  ;;  %v4219_v30 = vpop.f32.mrf.mxu0 }
 0xd81   :  { %v2539_v55 = vpop.f32.mrf.mxu1  ;;  %v2214_v40 = vsel %vm299_vm3, %v2211_v29, -inf }
 0xd82   :  { %v2540_v54 = vadd.f32 %v2539_v55, %v4736_v38  ;;  %2215 = vmax.xlane.f32.xlu0 %v2214_v40 }
 0xd83   :  { %v4239_v41 = vpop.f32.mrf.mxu1 }
 0xd84   :  { %v2543_v56 = vsel %vm299_vm3, %v2540_v54, -inf }
 0xd85   :  { %v2704_v63 = vpop.f32.mrf.mxu1 }
 0xd86   :  { %v2705_v1 = vadd.f32 %v2704_v63, %v4783_v50  ;;  %2544 = vmax.xlane.f32.xlu0 %v2543_v56 }
 0xd87   :  { %v4249_v8 = vpop.f32.mrf.mxu1 }
 0xd88   :  { %v2708_v49 = vsel %vm299_vm3, %v2705_v1, -inf }
 0xd89   :  { %v2869_v19 = vpop.f32.mrf.mxu1 }
 0xd8a   :  { %v2870_v20 = vadd.f32 %v2869_v19, %v4736_v38  ;;  %2709 = vmax.xlane.f32.xlu0 %v2708_v49 }
 0xd8b   :  { %v4259_v21 = vpop.f32.mrf.mxu1 }
 0xd8c   :  { %v2873_v23 = vsel %vm299_vm3, %v2870_v20, -inf }
 0xd8d   :  { %v3034_v24 = vpop.f32.mrf.mxu1 }
 0xd8e   :  { %2874 = vmax.xlane.f32.xlu0 %v2873_v23  ;;  %v5179_v0 = vadd.f32 %v3034_v24, %v4783_v50 }
 0xd8f   :  { %v4269_v2 = vpop.f32.mrf.mxu1 }
 0xd90   :  { %v3038_v17 = vsel %vm299_vm3, %v5179_v0, -inf }
 0xd91   :  { %3048 = vrot.lane.b32.xlu1 %v5074_v27, %s4534_s23  ;;  %v3199_v15 = vpop.f32.mrf.mxu1 }
 0xd92   :  { %v5189_v12 = vadd.f32 %v3199_v15, %v4736_v38 }
 0xd93   :  { %v4279_v46 = vpop.f32.mrf.mxu1 }
 0xd94   :  { %v3203_v36 = vsel %vm299_vm3, %v5189_v12, -inf }
 0xd95   :  { %v3364_v3 = vpop.f32.mrf.mxu1 }
 0xd96   :  { %v5182_v32 = vadd.f32 %v3364_v3, %v4783_v50  ;;  %v2389_v50 = vpop.permute.xlu1 %2388 }
 0xd97   :  { %v4289_v31 = vpop.f32.mrf.mxu1 }
 0xd98   :  { %v3368_v33 = vsel %vm299_vm3, %v5182_v32, -inf }
 0xd9a   :  { %v2719_v37 = vpop.permute.xlu1 %2718 }
 0xd9e   :  { %v2554_v39 = vpop.permute.xlu1 %2553 }
 0xda4   :  { %2883 = vrot.lane.b32.xlu0 %v5077_v28, %s4534_s23 }
 0xdb5   :  { %3039 = vmax.xlane.f32.xlu1 %v3038_v17 }
 0xdb9   :  { %3369 = vmax.xlane.f32.xlu1 %v3368_v33 }
 0xdc3   :  { %3204 = vmax.xlane.f32.xlu0 %v3203_v36 }
 0xdca   :  { %3378 = vrot.lane.b32.xlu1 %v5074_v27, %s4535_s26 }
 0xdd9   :  { %3213 = vrot.lane.b32.xlu0 %v5077_v28, %s4535_s26 }
 0xe09   :  { %v2380_v42 = vpop.xlane.xlu1 %2379 }
 0xe0a   :  { %v2381_v43 = vsub.f32 %v2375_v48, %v2380_v42 }
 0xe0b   :  { %v2216_v44 = vpop.xlane.xlu0 %2215 }
 0xe0c   :  { %v2217_v45 = vsub.f32 %v2211_v29, %v2216_v44  ;;  %v2382_v38 = vmul.f32 1.442695, %v2381_v43 }
 0xe0d   :  { %v3049_v21 = vpop.permute.xlu1 %3048 }
 0xe0e   :  { %v2218_v52 = vmul.f32 1.442695, %v2217_v45 }
 0xe0f   :  { %v2545_v57 = vpop.xlane.xlu0 %2544 }
 0xe10   :  { %4405 = vpow2.f32 %v2218_v52  ;;  %v2546_v53 = vsub.f32 %v2540_v54, %v2545_v57 }
 0xe11   :  { %4407 = vpow2.f32 %v2382_v38 }
 0xe12   :  { %v2547_v30 = vmul.f32 1.442695, %v2546_v53 }
 0xe13   :  { %v2710_v55 = vpop.xlane.xlu0 %2709 }
 0xe14   :  { %4409 = vpow2.f32 %v2547_v30  ;;  %v2711_v27 = vsub.f32 %v2705_v1, %v2710_v55 }
 0xe16   :  { %v2712_v40 = vmul.f32 1.442695, %v2711_v27 }
 0xe17   :  { %v2875_v41 = vpop.xlane.xlu0 %2874 }
 0xe18   :  { %4411 = vpow2.f32 %v2712_v40  ;;  %v2876_v28 = vsub.f32 %v2870_v20, %v2875_v41 }
 0xe1a   :  { %v2877_v56 = vmul.f32 1.442695, %v2876_v28 }
 0xe1b   :  { %v2884_v19 = vpop.permute.xlu0 %2883 }
 0xe1c   :  { %4413 = vpow2.f32 %v2877_v56 }
 0xe1d   :  { %v5197_v63 = vpop.eup %4405 }
 0xe1e   :  { %4223 = vmatmul.mubr.msk.f32.vlgmr.msra.gmra.mxu0 %vm299_vm3, %v5197_v63  ;;  %v4408_v48 = vpop.eup %4407  ;;  %v2220_v44 = vsel %vm299_vm3, %v5197_v63, 0.0 }
 0xe1f   :  { %4231 = vmatpush3.msra.mxu0 %v2389_v50  ;;  %4232 = vmatprep.mubr.msk.f32.mxu0 %vm4524_vm2, %v4523_v13 }
 0xe20   :  { %4240 = vmatprep.subr.mxu0 %v4523_v13 }
 0xe21   :  { %v4410_v29 = vpop.eup %4409 }
 0xe22   :  { %4233 = vmatmul.mubr.msk.f32.vlgmr.msra.gmra.mxu0 %vm299_vm3, %v4408_v48  ;;  %v2549_v54 = vsel %vm299_vm3, %v4410_v29, 0.0 }
 0xe23   :  { %4241 = vmatpush3.msra.mxu0 %v2554_v39  ;;  %2550 = vadd.xlane.f32.xlu0 %v2549_v54 }
 0xe24   :  { %4242 = vmatprep.mubr.msk.f32.mxu0 %vm4524_vm2, %v4523_v13  ;;  %4250 = vmatprep.subr.mxu0 %v4523_v13 }
 0xe25   :  { %v4412_v1 = vpop.eup %4411 }
 0xe26   :  { %4243 = vmatmul.mubr.msk.f32.vlgmr.msra.gmra.mxu0 %vm299_vm3, %v4410_v29  ;;  %v2714_v8 = vsel %vm299_vm3, %v4412_v1, 0.0 }
 0xe27   :  { %4251 = vmatpush3.msra.mxu0 %v2719_v37  ;;  %2715 = vadd.xlane.f32.xlu1 %v2714_v8 }
 0xe28   :  { %4252 = vmatprep.mubr.msk.f32.mxu0 %vm4524_vm2, %v4523_v13  ;;  %4260 = vmatprep.subr.mxu0 %v4523_v13 }
 0xe29   :  { %v4414_v49 = vpop.eup %4413 }
 0xe2a   :  { %4253 = vmatmul.mubr.msk.f32.vlgmr.msra.gmra.mxu0 %vm299_vm3, %v4412_v1  ;;  %v2879_v20 = vsel %vm299_vm3, %v4414_v49, 0.0 }
 0xe2b   :  { %4261 = vmatpush3.msra.mxu0 %v2884_v19  ;;  %2880 = vadd.xlane.f32.xlu0 %v2879_v20 }
 0xe2c   :  { %4262 = vmatprep.mubr.msk.f32.mxu0 %vm4524_vm2, %v4523_v13  ;;  %4270 = vmatprep.subr.mxu0 %v4523_v13 }
 0xe2e   :  { %4263 = vmatmul.mubr.msk.f32.vlgmr.msra.gmra.mxu0 %vm299_vm3, %v4414_v49 }
 0xe2f   :  { %4271 = vmatpush3.msra.mxu0 %v3049_v21  ;;  %4272 = vmatprep.mubr.msk.f32.mxu0 %vm4524_vm2, %v4523_v13 }
 0xe30   :  { %4280 = vmatprep.subr.mxu0 %v4523_v13 }
 0xe3e   :  { %v3040_v23 = vpop.xlane.xlu1 %3039 }
 0xe3f   :  { %v3041_v24 = vsub.f32 %v5179_v0, %v3040_v23 }
 0xe41   :  { %v3042_v2 = vmul.f32 1.442695, %v3041_v24 }
 0xe42   :  { %v3370_v15 = vpop.xlane.xlu1 %3369 }
 0xe43   :  { %4415 = vpow2.f32 %v3042_v2  ;;  %v3371_v46 = vsub.f32 %v5182_v32, %v3370_v15 }
 0xe45   :  { %v3372_v3 = vmul.f32 1.442695, %v3371_v46 }
 0xe46   :  { %v3379_v42 = vpop.permute.xlu1 %3378 }
 0xe47   :  { %4417 = vpow2.f32 %v3372_v3 }
 0xe4c   :  { %v3205_v31 = vpop.xlane.xlu0 %3204 }
 0xe4d   :  { %v3206_v17 = vsub.f32 %v5189_v12, %v3205_v31  ;;  %v2384_v12 = vsel %vm299_vm3, %v4408_v48, 0.0 }
 0xe4f   :  { %v3207_v33 = vmul.f32 1.442695, %v3206_v17 }
 0xe50   :  { %v4416_v36 = vpop.eup %4415  ;;  %v3214_v50 = vpop.permute.xlu0 %3213 }
 0xe51   :  { %4419 = vpow2.f32 %v3207_v33  ;;  %4273 = vmatmul.mubr.msk.f32.vlgmr.msra.gmra.mxu0 %vm299_vm3, %v4416_v36  ;;  %v3044_v37 = vsel %vm299_vm3, %v4416_v36, 0.0 }
 0xe52   :  { %4281 = vmatpush3.msra.mxu0 %v3214_v50  ;;  %3045 = vadd.xlane.f32.xlu0 %v3044_v37 }
 0xe53   :  { %4282 = vmatprep.mubr.msk.f32.mxu0 %vm4524_vm2, %v4523_v13  ;;  %4290 = vmatprep.subr.mxu0 %v4523_v13 }
 0xe54   :  { %v4418_v0 = vpop.eup %4417 }
 0xe55   :  { %v3374_v32 = vsel %vm299_vm3, %v4418_v0, 0.0 }
 0xe56   :  { %3375 = vadd.xlane.f32.xlu1 %v3374_v32 }
 0xe5a   :  { %2385 = vadd.xlane.f32.xlu1 %v2384_v12 }
 0xe5e   :  { %v4420_v39 = vpop.eup %4419 }
 0xe5f   :  { %4283 = vmatmul.mubr.msk.f32.vlgmr.msra.gmra.mxu0 %vm299_vm3, %v4420_v39  ;;  %v3209_v43 = vsel %vm299_vm3, %v4420_v39, 0.0 }
 0xe60   :  { %4291 = vmatpush3.msra.mxu0 %v3379_v42  ;;  %3210 = vadd.xlane.f32.xlu0 %v3209_v43 }
 0xe61   :  { %4292 = vmatprep.mubr.msk.f32.mxu0 %vm4524_vm2, %v4523_v13  ;;  %4306 = vmatprep.subr.mxu0 %v4910_v11 }
 0xe63   :  { %4293 = vmatmul.mubr.msk.f32.vlgmr.msra.gmra.mxu0 %vm299_vm3, %v4418_v0 }
 0xe64   :  { %2221 = vadd.xlane.f32.xlu0 %v2220_v44  ;;  %4307 = vmatpush3.msra.mxu0 %v4910_v11 }
 0xe65   :  { %4308 = vmatprep.subr.mxu0 %v4917_v34 }
 0xe66   :  { %4309 = vmatpush3.msra.mxu0 %v4917_v34 }
 0xe67   :  { %4310 = vmatprep.subr.mxu0 %v4922_v35 }
 0xe68   :  { %4311 = vmatpush3.msra.mxu0 %v4922_v35 }
 0xe69   :  { %4312 = vmatprep.subr.mxu0 %v4929_v18 }
 0xe6a   :  { %4313 = vmatpush3.msra.mxu0 %v4929_v18 }
 0xeac   :  { %v2551_v13 = vpop.xlane.xlu0 %2550 }
 0xead   :  { %4421 = vrcp.f32 %v2551_v13 }
 0xeb0   :  { %v2716_v45 = vpop.xlane.xlu1 %2715 }
 0xeb1   :  { %4423 = vrcp.f32 %v2716_v45 }
 0xeb4   :  { %v2881_v52 = vpop.xlane.xlu0 %2880 }
 0xeb5   :  { %4425 = vrcp.f32 %v2881_v52 }
 0xeba   :  { %v4422_v30 = vpop.eup %4421 }
 0xebe   :  { %v4424_v35 = vpop.eup %4423 }
 0xec2   :  { %v4426_v28 = vpop.eup %4425 }
 0xedb   :  { %v3046_v29 = vpop.xlane.xlu0 %3045 }
 0xedc   :  { %4427 = vrcp.f32 %v3046_v29 }
 0xede   :  { %v2296_v38 = vpop.f32.mrf.mxu0 }
 0xedf   :  { %v3376_v19 = vpop.xlane.xlu1 %3375 }
 0xee0   :  { %v4224_v57 = vpop.f32.mrf.mxu0 }
 0xee2   :  { %v2460_v11 = vpop.f32.mrf.mxu0 }
 0xee3   :  { %v2386_v33 = vpop.xlane.xlu1 %2385 }
 0xee4   :  { %v4234_v53 = vpop.f32.mrf.mxu0 }
 0xee6   :  { %v2625_v34 = vpop.f32.mrf.mxu0 }
 0xee7   :  { %v2629_v55 = vmul.f32 %v4422_v30, %v2625_v34 }
 0xee8   :  { %v4244_v27 = vpop.f32.mrf.mxu0 }
 0xee9   :  { %3456 = vrot.lane.b32.xlu0 %v2629_v55, %s4521_s25  ;;  %v3211_v54 = vpop.xlane.xlu0 %3210  ;;  %v4428_v1 = vpop.eup %4427 }
 0xeea   :  { %v2790_v40 = vpop.f32.mrf.mxu0  ;;  %4429 = vrcp.f32 %v3211_v54 }
 0xeeb   :  { %v2794_v41 = vmul.f32 %v4424_v35, %v2790_v40  ;;  %4431 = vrcp.f32 %v3376_v19 }
 0xeec   :  { %v4254_v18 = vpop.f32.mrf.mxu0 }
 0xeed   :  { %3471 = vrot.lane.b32.xlu1 %v2794_v41, %s4521_s25  ;;  %v2222_v17 = vpop.xlane.xlu0 %2221 }
 0xeee   :  { %v2955_v56 = vpop.f32.mrf.mxu0  ;;  %4433 = vrcp.f32 %v2222_v17 }
 0xeef   :  { %v2959_v63 = vmul.f32 %v4426_v28, %v2955_v56  ;;  %4435 = vrcp.f32 %v2386_v33 }
 0xef0   :  { %v4264_v48 = vpop.f32.mrf.mxu0 }
 0xef1   :  { %3460 = vrot.lane.b32.xlu1 %v2959_v63, %s4536_s4 }
 0xef7   :  { %v4430_v21 = vpop.eup %4429 }
 0xef8   :  { %v4432_v15 = vpop.eup %4431 }
 0xefb   :  { %v4434_v50 = vpop.eup %4433 }
 0xefc   :  { %v2300_v32 = vmul.f32 %v4434_v50, %v2296_v38  ;;  %v4436_v12 = vpop.eup %4435 }
 0xefd   :  { %v2464_v44 = vmul.f32 %v4436_v12, %v2460_v11 }
 0xf11   :  { %v3120_v8 = vpop.f32.mrf.mxu0 }
 0xf12   :  { %v3124_v49 = vmul.f32 %v4428_v1, %v3120_v8 }
 0xf13   :  { %v4274_v20 = vpop.f32.mrf.mxu0 }
 0xf14   :  { %3475 = vrot.lane.b32.xlu0 %v3124_v49, %s4536_s4 }
 0xf1f   :  { %v3285_v23 = vpop.f32.mrf.mxu0 }
 0xf20   :  { %v3289_v24 = vmul.f32 %v4430_v21, %v3285_v23 }
 0xf21   :  { %v4284_v2 = vpop.f32.mrf.mxu0 }
 0xf22   :  { %3464 = vrot.lane.b32.xlu1 %v3289_v24, %s4537_s29 }
 0xf23   :  { %v3450_v46 = vpop.f32.mrf.mxu0 }
 0xf24   :  { %v3454_v3 = vmul.f32 %v4432_v15, %v3450_v46 }
 0xf25   :  { %v4294_v31 = vpop.f32.mrf.mxu0 }
 0xf26   :  { %3479 = vrot.lane.b32.xlu1 %v3454_v3, %s4537_s29 }
 0xf5b   :  { %v3457_v37 = vpop.permute.xlu0 %3456 }
 0xf5c   :  { %v3467_v39 = vsel %vm299_vm3, %v2300_v32, %v3457_v37 }
 0xf5f   :  { %v3472_v36 = vpop.permute.xlu1 %3471 }
 0xf60   :  { %v3482_v52 = vsel %vm299_vm3, %v2464_v44, %v3472_v36 }
 0xf63   :  { %v3461_v0 = vpop.permute.xlu1 %3460 }
 0xf64   :  { %v3468_v42 = vsel %vm122_vm0, %v3467_v39, %v3461_v0 }
 0xf86   :  { %v3476_v13 = vpop.permute.xlu0 %3475 }
 0xf87   :  { %v3483_v57 = vsel %vm122_vm0, %v3482_v52, %v3476_v13 }
 0xf94   :  { %v3465_v43 = vpop.permute.xlu1 %3464 }
 0xf95   :  { %v3469_v45 = vsel %vm1633_vm4, %v3468_v42, %v3465_v43 }
 0xf96   :  { %4303 = vmatprep.mubr.msk.f32.mxu1 %vm210_vm1, %v3469_v45 }
 0xf98   :  { %v3480_v53 = vpop.permute.xlu1 %3479 }
 0xf99   :  { %v3484_v30 = vsel %vm1633_vm4, %v3483_v57, %v3480_v53 }
 0xf9a   :  { %4304 = vmatmul.mubr.msk.f32.vlgmr.msra.gmra.mxu1 %vm210_vm1, %v3484_v30 }
 0xf9b   :  { %4318 = vmatpush3.msra.mxu1 %v4969_v58 }
 0xf9c   :  { %4319 = vmatprep.subr.mxu1 %v4976_v4 }
 0xf9d   :  { %4320 = vmatpush3.msra.mxu1 %v4976_v4 }
 0xf9e   :  { %4321 = vmatprep.subr.mxu1 %v4983_v5 }
 0xf9f   :  { %4322 = vmatpush3.msra.mxu1 %v4983_v5 }
 0xfa0   :  { %4323 = vmatprep.subr.mxu1 %v4990_v6 }
 0xfa1   :  { %4324 = vmatpush3.msra.mxu1 %v4990_v6 }
 0xfa2   :  { %4325 = vmatprep.subr.mxu1 %v4997_v7 }
 0xfa3   :  { %4326 = vmatpush3.msra.mxu1 %v4997_v7 }
 0xfa4   :  { %4327 = vmatprep.subr.mxu1 %v5004_v59 }
 0xfa5   :  { %4328 = vmatpush3.msra.mxu1 %v5004_v59 }
 0xfa6   :  { %4329 = vmatprep.subr.mxu1 %v5011_v60 }
 0xfa7   :  { %4330 = vmatpush3.msra.mxu1 %v5011_v60 }
 0xfa8   :  { %4331 = vmatprep.subr.mxu1 %v5018_v61 }
 0xfa9   :  { %4332 = vmatpush3.msra.mxu1 %v5018_v61 }
0x105a   :  { %v4305_v58 = vpop.f32.mrf.mxu1 }
0x105b   :  { %v3563_v4 = vadd.f32 %v4305_v58, %v4897_v10 }
0x105c   :  { %v3557_v5 = vpop.f32.mrf.mxu1 }
0x105d   :  { %v3567_v6 = vadd.f32 %v3563_v4, %v5065_v26  ;;  %v3558_v7 = vadd.f32 %v4897_v10, %v3557_v5 }
0x105f   :  { %v3571_v38 = vsel %vm210_vm1, %v3567_v6, 0.0  ;;  %v3566_v59 = vadd.f32 %v3558_v7, %v5062_v25 }
0x1060   :  { %3572 = vadd.xlane.f32.xlu1 %v3571_v38 }
0x1061   :  { %v3568_v11 = vsel %vm210_vm1, %v3566_v59, 0.0 }
0x1062   :  { %3569 = vadd.xlane.f32.xlu0 %v3568_v11 }
0x10e9   :  { %v3573_v60 = vpop.xlane.xlu1 %3572 }
0x10ea   :  { %v3575_v34 = vmul.f32 0.03125, %v3573_v60 }
0x10eb   :  { %v3570_v55 = vpop.xlane.xlu0 %3569 }
0x10ec   :  { %v3574_v61 = vmul.f32 0.03125, %v3570_v55  ;;  %v3577_v27 = vsub.f32 %v3567_v6, %v3575_v34 }
0x10ee   :  { %v3576_v35 = vsub.f32 %v3566_v59, %v3574_v61  ;;  %v3579_v26 = vmul.f32 %v3577_v27, %v3577_v27 }
0x10f0   :  { %v3578_v40 = vmul.f32 %v3576_v35, %v3576_v35  ;;  %v3583_v10 = vsel %vm210_vm1, %v3579_v26, 0.0 }
0x10f2   :  { %v3580_v41 = vsel %vm210_vm1, %v3578_v40, 0.0 }
0x10f3   :  { %3581 = vadd.xlane.f32.xlu0 %v3580_v41 }
0x10f7   :  { %3584 = vadd.xlane.f32.xlu0 %v3583_v10 }
0x117c   :  { %v3582_v18 = vpop.xlane.xlu0 %3581 }
0x117d   :  { %v3586_v25 = vmul.f32 0.03125, %v3582_v18 }
0x117f   :  { %v3588_v28 = vadd.f32 1e-12, %v3586_v25 }
0x1180   :  { %v3585_v56 = vpop.xlane.xlu0 %3584 }
0x1181   :  { %4437 = vrsqrt.f32 %v3588_v28  ;;  %v3587_v63 = vmul.f32 0.03125, %v3585_v56 }
0x1183   :  { %v3589_v48 = vadd.f32 1e-12, %v3587_v63 }
0x1185   :  { %4439 = vrsqrt.f32 %v3589_v48 }
0x118e   :  { %v4438_v29 = vpop.eup %4437 }
0x118f   :  { %v3592_v54 = vmul.f32 %v4438_v29, %v3576_v35 }
0x1191   :  { %v3594_v1 = vmul.f32 %v4939_v47, %v3592_v54 }
0x1192   :  { %v4440_v8 = vpop.eup %4439 }
0x1193   :  { %v3593_v49 = vmul.f32 %v4440_v8, %v3577_v27  ;;  %v5287_v19 = vadd.f32 %v4944_v51, %v3594_v1 }
0x1195   :  { %4314 = vmatprep.mubr.msk.f32.mxu0 %vm210_vm1, %v5287_v19  ;;  %v3595_v20 = vmul.f32 %v4939_v47, %v3593_v49 }
0x1197   :  { %v5293_v21 = vadd.f32 %v4944_v51, %v3595_v20 }
0x1199   :  { %4315 = vmatmul.mubr.msk.f32.vlgmr.msra.gmra.mxu0 %vm210_vm1, %v5293_v21 }
0x1259   :  { %v4316_v23 = vpop.f32.mrf.mxu0 }
0x125a   :  { %v3676_v24 = vadd.f32 %v4316_v23, %v5026_v62 }
0x125b   :  { %v3670_v2 = vpop.f32.mrf.mxu0 }
0x125c   :  { %v3682_v15 = vmul.f32 0.70710677, %v3676_v24  ;;  %v3671_v46 = vadd.f32 %v5026_v62, %v3670_v2  ;;  %v3680_v48 = vmul.f32 0.5, %v3676_v24 }
0x125e   :  { %v3688_v3 = vand.u32 2147483647, %v3682_v15  ;;  %v3681_v31 = vmul.f32 0.70710677, %v3671_v46  ;;  %vm3684_vm8 = vcmp.ge.f32.partialorder %v3682_v15, 0.0  ;;  %v3679_v56 = vmul.f32 0.5, %v3671_v46 }
0x125f   :  { %v3686_v40 = vsel %vm3684_vm8, 1.0, %v4538_v14 }
0x1260   :  { %v3690_v17 = vmul.f32 0.3275911, %v3688_v3  ;;  %v3687_v33 = vand.u32 2147483647, %v3681_v31  ;;  %v3716_v51 = vsub.f32 0.0, %v3688_v3  ;;  %vm3683_vm9 = vcmp.ge.f32.partialorder %v3681_v31, 0.0 }
0x1261   :  { %v3685_v18 = vsel %vm3683_vm9, 1.0, %v4538_v14 }
0x1262   :  { %v3692_v36 = vadd.f32 1.0, %v3690_v17  ;;  %v3689_v50 = vmul.f32 0.3275911, %v3687_v33  ;;  %v3715_v37 = vsub.f32 0.0, %v3687_v33  ;;  %v3718_v0 = vmul.f32 %v3716_v51, %v3688_v3 }
0x1264   :  { %4441 = vrcp.f32 %v3692_v36  ;;  %v3691_v47 = vadd.f32 1.0, %v3689_v50  ;;  %v3717_v12 = vmul.f32 %v3715_v37, %v3687_v33  ;;  %v3721_v42 = vmul.f32 1.442695, %v3718_v0 }
0x1266   :  { %4443 = vrcp.f32 %v3691_v47  ;;  %v3719_v62 = vmul.f32 1.442695, %v3717_v12 }
0x1267   :  { %4445 = vpow2.f32 %v3721_v42 }
0x1268   :  { %4447 = vpow2.f32 %v3719_v62 }
0x1271   :  { %v4442_v32 = vpop.eup %4441 }
0x1272   :  { %v3698_v39 = vmul.f32 1.0614054, %v4442_v32 }
0x1273   :  { %v4444_v43 = vpop.eup %4443 }
0x1274   :  { %v3700_v44 = vadd.f32 -1.4531521, %v3698_v39  ;;  %v3697_v13 = vmul.f32 1.0614054, %v4444_v43  ;;  %v4446_v60 = vpop.eup %4445 }
0x1275   :  { %v4448_v27 = vpop.eup %4447 }
0x1276   :  { %v3702_v45 = vmul.f32 %v4442_v32, %v3700_v44  ;;  %v3699_v52 = vadd.f32 -1.4531521, %v3697_v13 }
0x1278   :  { %v3704_v57 = vadd.f32 1.4214138, %v3702_v45  ;;  %v3701_v53 = vmul.f32 %v4444_v43, %v3699_v52 }
0x127a   :  { %v3706_v30 = vmul.f32 %v4442_v32, %v3704_v57  ;;  %v3703_v58 = vadd.f32 1.4214138, %v3701_v53 }
0x127c   :  { %v3708_v4 = vadd.f32 -0.28449672, %v3706_v30  ;;  %v3705_v5 = vmul.f32 %v4444_v43, %v3703_v58 }
0x127e   :  { %v3710_v6 = vmul.f32 %v4442_v32, %v3708_v4  ;;  %v3707_v7 = vadd.f32 -0.28449672, %v3705_v5 }
0x1280   :  { %v3712_v38 = vadd.f32 0.2548296, %v3710_v6  ;;  %v3709_v59 = vmul.f32 %v4444_v43, %v3707_v7 }
0x1282   :  { %v3714_v11 = vmul.f32 %v4442_v32, %v3712_v38  ;;  %v3711_v34 = vadd.f32 0.2548296, %v3709_v59 }
0x1284   :  { %v3724_v55 = vmul.f32 %v4446_v60, %v3714_v11  ;;  %v3713_v61 = vmul.f32 %v4444_v43, %v3711_v34 }
0x1286   :  { %v3726_v35 = vsub.f32 1.0, %v3724_v55  ;;  %v3723_v41 = vmul.f32 %v4448_v27, %v3713_v61 }
0x1288   :  { %v3728_v26 = vmul.f32 %v3726_v35, %v3686_v40  ;;  %v3725_v10 = vsub.f32 1.0, %v3723_v41 }
0x128a   :  { %v3727_v25 = vmul.f32 %v3725_v10, %v3685_v18  ;;  %v3730_v28 = vadd.f32 1.0, %v3728_v26 }
0x128c   :  { %v3729_v63 = vadd.f32 1.0, %v3727_v25  ;;  %v3732_v54 = vmul.f32 %v3730_v28, %v3680_v48 }
0x128e   :  { %v3731_v29 = vmul.f32 %v3729_v63, %v3679_v56 }
0x1290   :  { %4333 = vmatprep.mubr.msk.f32.mxu1 %vm1930_vm7, %v3731_v29 }
0x1291   :  { %4334 = vmatmul.mubr.msk.f32.vlgmr.msra.gmra.mxu1 %vm1930_vm7, %v3732_v54 }
0x1351   :  { %v4335_v1 = vpop.f32.mrf.mxu1 }
0x1352   :  { %v3811_v8 = vadd.f32 %v4335_v1, %v5039_v9 }
0x1353   :  { %v3805_v49 = vpop.f32.mrf.mxu1 }
0x1354   :  { %v3815_v20 = vadd.f32 %v3811_v8, %v5293_v21  ;;  %v3806_v23 = vadd.f32 %v5039_v9, %v3805_v49 }
0x1356   :  { %v3819_v14 = vsel %vm210_vm1, %v3815_v20, 0.0  ;;  %v3814_v2 = vadd.f32 %v3806_v23, %v5287_v19 }
0x1357   :  { %3820 = vadd.xlane.f32.xlu1 %v3819_v14 }
0x1358   :  { %v3816_v24 = vsel %vm210_vm1, %v3814_v2, 0.0 }
0x1359   :  { %3817 = vadd.xlane.f32.xlu0 %v3816_v24 }
0x13e0   :  { %v3821_v15 = vpop.xlane.xlu1 %3820 }
0x13e1   :  { %v3823_v46 = vmul.f32 0.03125, %v3821_v15 }
0x13e2   :  { %v3818_v3 = vpop.xlane.xlu0 %3817 }
0x13e3   :  { %v3825_v31 = vsub.f32 %v3815_v20, %v3823_v46  ;;  %v3822_v17 = vmul.f32 0.03125, %v3818_v3 }
0x13e5   :  { %v3824_v33 = vsub.f32 %v3814_v2, %v3822_v17  ;;  %v3827_v36 = vmul.f32 %v3825_v31, %v3825_v31 }
0x13e7   :  { %v3831_v50 = vsel %vm210_vm1, %v3827_v36, 0.0  ;;  %v3826_v21 = vmul.f32 %v3824_v33, %v3824_v33 }
0x13e8   :  { %3832 = vadd.xlane.f32.xlu1 %v3831_v50 }
0x13e9   :  { %v3828_v9 = vsel %vm210_vm1, %v3826_v21, 0.0 }
0x13ea   :  { %3829 = vadd.xlane.f32.xlu0 %v3828_v9 }
0x1471   :  { %v3833_v47 = vpop.xlane.xlu1 %3832 }
0x1472   :  { %v3835_v19 = vmul.f32 0.03125, %v3833_v47 }
0x1473   :  { %v3830_v51 = vpop.xlane.xlu0 %3829 }
0x1474   :  { %v3837_v37 = vadd.f32 1e-12, %v3835_v19  ;;  %v3834_v0 = vmul.f32 0.03125, %v3830_v51 }
0x1476   :  { %4449 = vrsqrt.f32 %v3837_v37  ;;  %v3836_v32 = vadd.f32 1e-12, %v3834_v0 }
0x1478   :  { %4451 = vrsqrt.f32 %v3836_v32 }
0x1483   :  { %v4450_v12 = vpop.eup %4449 }
0x1484   :  { %v3841_v39 = vmul.f32 %v4450_v12, %v3825_v31 }
0x1485   :  { %v4452_v42 = vpop.eup %4451 }
0x1486   :  { %v3840_v43 = vmul.f32 %v4452_v42, %v3824_v33  ;;  %v3843_v44 = vmul.f32 %v5052_v16, %v3841_v39 }
0x1488   :  { %v3842_v13 = vmul.f32 %v5052_v16, %v3840_v43  ;;  %v3845_v62 = vadd.f32 %v5058_v22, %v3843_v44 }
0x148a   :  { %v3844_v45 = vadd.f32 %v5058_v22, %v3842_v13  ;;  %3847 = vst.msk [vmem:[#allocation7 + $0x8] sm:$0xff] %vm210_vm1, %v3845_v62 }
0x148c   :  { %3846 = vst.msk [vmem:[#allocation7] sm:$0xff] %vm210_vm1, %v3844_v45 }
0x148d   :  { %4504 = shalt.err (!%p4501_p0)
}
0x148e   :  { %3859 = dma.vmem_to_hbm [thread:$0]  %s3854_s15, 256, %s5339_s16, [#allocation4], %s4520_s24, %s4520_s24, %s4521_s25  }
0x148f   :  { %4517 = dma.done.wait [#allocation4], 256  }
0x1490   :  { %4518 = vsyncadd [#allocation4], 4294967040 }
0x1491   :  { %3863 = vsyncpa [#allocation3], 1 }
0x1492   :  { %3864 = vsyncpa [#allocation6], 1 }
0x1493   :  { %3865 = vsyncpa [#allocation4], 1 }

</bundles_post_ra>
